<compile_context>
chip_gen: v5e
topology: v5e:2x2
jax: 0.10.0
libtpu: 0.0.40
codegen_flags: <defaults>
</compile_context>

<pallas_src>
import jax
import jax.numpy as jnp
from jax import lax
from jax.experimental import pallas as pl
from jax.experimental.pallas import tpu as pltpu


# ---------------------------------------------------------------------------
# hardware-aware sizing helpers
# ---------------------------------------------------------------------------

def _vmem_capacity():
    try:
        info = pltpu.get_tpu_info()
        cap = getattr(info, "vmem_capacity_bytes", None)
        if cap:
            return int(cap)
    except Exception:
        pass
    return 64 << 20   # conservative default (v7x per-core VMEM)


def _vmem_limit(block_bytes, vmem_cap):
    """Scoped-VMEM limit: double-buffered blocks + headroom, <=75% of physical."""
    cap = max(16 << 20, (int(vmem_cap) * 3) // 4)     # ~48 MiB on v7x, ~96 on v5e/v6e
    need = 4 * int(block_bytes) + (4 << 20)
    return int(min(max(need, 16 << 20), cap))


def _pick_rec_chunk(T, B, H, vmem_cap, requested=None):
    """Recurrence time-chunk.  T is padded up to a chunk multiple (tail masked)."""
    if requested is not None:
        C = max(1, min(int(requested), T))
    else:
        # streamed bytes per time step: gxf+gxb reads (bf16) + outf+outb writes
        per_step = B * (2 * 4 * H * 2 + 2 * H * 4)
        target = (2 << 20) if vmem_cap <= (96 << 20) else (4 << 20)
        C = max(1, min(T, target // max(per_step, 1)))
    n = (T + C - 1) // C
    return C, n, n * C


def _pick_proj_chunk(C, n_chunks, B, H, xs, vmem_cap):
    """Projection chunk = m * recurrence chunk (m divides n_chunks), HBM-roofline sized."""
    per_step = B * (sum(int(x.shape[2]) * int(x.dtype.itemsize) for x in xs)
                    + 8 * H * 2)
    target = (4 << 20) if vmem_cap <= (96 << 20) else (8 << 20)
    m = max(1, min(n_chunks, target // max(per_step * C, 1)))
    while n_chunks % m:
        m -= 1
    return C * m, n_chunks // m


# ---------------------------------------------------------------------------
# Kernel 1: hoisted input projection (single fused (D, 8H) matmul)
# ---------------------------------------------------------------------------

def _make_proj_kernel(n_in, merged, H):
    """Gx[t] = sum_i x_i[t] @ W_i + b  for one time chunk.

    n_in == 1: layer-0 input (C, B, D) with W (D, 8H).
    n_in == 2: deeper layers: outf/outb (C, B, H) with split W halves (H, 8H),
               summed in-kernel (replaces the inter-layer concat).
    merged:    single (C, B, 8H) output; else split into two (C, B, 4H) outputs.
    """
    def kernel(*refs):
        in_refs = refs[:n_in]
        w_refs = refs[n_in:2 * n_in]
        b_ref = refs[2 * n_in]
        out_refs = refs[2 * n_in + 1:]

        C, B = in_refs[0].shape[0], in_refs[0].shape[1]
        acc = None
        for x_ref, w_ref in zip(in_refs, w_refs):
            D = x_ref.shape[2]
            # B is padded to a multiple of 8, so this reshape is a free
            # reinterpretation (no sublane relayout).
            x2 = x_ref[...].reshape(C * B, D).astype(w_ref.dtype)
            d = jnp.dot(x2, w_ref[...], preferred_element_type=jnp.float32)
            acc = d if acc is None else acc + d
        acc = acc + b_ref[...]

        if merged:
            G8 = acc.shape[1]
            out_refs[0][...] = acc.reshape(C, B, G8).astype(out_refs[0].dtype)
        else:
            out_refs[0][...] = acc[:, :4 * H].reshape(C, B, 4 * H).astype(out_refs[0].dtype)
            out_refs[1][...] = acc[:, 4 * H:].reshape(C, B, 4 * H).astype(out_refs[1].dtype)
    return kernel


def _input_projection(xs, ws, bx, H, C, n_chunks, merged, vmem_cap):
    T_pad, B = int(xs[0].shape[0]), int(xs[0].shape[1])
    G8 = 8 * H
    gx_dtype = jnp.bfloat16

    in_specs = [pl.BlockSpec((C, B, int(x.shape[2])), lambda g: (g, 0, 0)) for x in xs]
    in_specs += [pl.BlockSpec(tuple(int(s) for s in w.shape), lambda g: (0, 0)) for w in ws]
    in_specs += [pl.BlockSpec((1, G8), lambda g: (0, 0))]

    if merged:
        out_shape = jax.ShapeDtypeStruct((T_pad, B, G8), gx_dtype)
        out_specs = pl.BlockSpec((C, B, G8), lambda g: (g, 0, 0))
        out_bytes = C * B * G8 * 2
    else:
        out_shape = (jax.ShapeDtypeStruct((T_pad, B, 4 * H), gx_dtype),
                     jax.ShapeDtypeStruct((T_pad, B, 4 * H), gx_dtype))
        out_specs = (pl.BlockSpec((C, B, 4 * H), lambda g: (g, 0, 0)),
                     pl.BlockSpec((C, B, 4 * H), lambda g: (g, 0, 0)))
        out_bytes = 2 * C * B * 4 * H * 2

    block_bytes = (sum(C * B * int(x.shape[2]) * int(x.dtype.itemsize) for x in xs)
                   + sum(int(w.size) * int(w.dtype.itemsize) for w in ws)
                   + G8 * 4 + out_bytes)

    grid_spec = pltpu.PrefetchScalarGridSpec(
        num_scalar_prefetch=0,
        grid=(n_chunks,),
        in_specs=in_specs,
        out_specs=out_specs,
    )
    return pl.pallas_call(
        _make_proj_kernel(len(xs), merged, H),
        out_shape=out_shape,
        grid_spec=grid_spec,
        compiler_params=pltpu.CompilerParams(
            dimension_semantics=("parallel",),           # independent chunks (megacore)
            vmem_limit_bytes=_vmem_limit(block_bytes, vmem_cap)),
    )(*xs, *ws, bx)


# ---------------------------------------------------------------------------
# Kernel 2: fused bidirectional recurrence, streamed over time chunks
# ---------------------------------------------------------------------------

def _make_bilstm_kernel(C, n_chunks, T_real, masked):
    def kernel(gxf_ref, gxb_ref, whf_ref, whb_ref,
               outf_ref, outb_ref, hN_ref, cN_ref,
               hf_sc, cf_sc, hb_sc, cb_sc):
        H = outf_ref.shape[2]
        g = pl.program_id(0)
        cdt = whf_ref.dtype

        @pl.when(g == 0)
        def _():
            hf_sc[...] = jnp.zeros_like(hf_sc)
            cf_sc[...] = jnp.zeros_like(cf_sc)
            hb_sc[...] = jnp.zeros_like(hb_sc)
            cb_sc[...] = jnp.zeros_like(cb_sc)

        def step(t, carry):
            h_f, c_f, h_b, c_b = carry
            # Two independent per-direction matmuls; the scheduler overlaps one
            # chain's MXU push with the other chain's EUP/VPU gate math.
            gh_f = jnp.dot(h_f.astype(cdt), whf_ref[...],
                           preferred_element_type=jnp.float32)
            gh_b = jnp.dot(h_b.astype(cdt), whb_ref[...],
                           preferred_element_type=jnp.float32)
            gf = gh_f + gxf_ref[t].astype(jnp.float32)
            gb = gh_b + gxb_ref[C - 1 - t].astype(jnp.float32)

            # PyTorch gate order: i, f, g, o.
            i_f = jax.nn.sigmoid(gf[:, 0 * H:1 * H])
            f_f = jax.nn.sigmoid(gf[:, 1 * H:2 * H])
            g_f = jnp.tanh(gf[:, 2 * H:3 * H])
            o_f = jax.nn.sigmoid(gf[:, 3 * H:4 * H])
            i_b = jax.nn.sigmoid(gb[:, 0 * H:1 * H])
            f_b = jax.nn.sigmoid(gb[:, 1 * H:2 * H])
            g_b = jnp.tanh(gb[:, 2 * H:3 * H])
            o_b = jax.nn.sigmoid(gb[:, 3 * H:4 * H])

            c_f_n = f_f * c_f + i_f * g_f
            c_b_n = f_b * c_b + i_b * g_b
            h_f_n = o_f * jnp.tanh(c_f_n)
            h_b_n = o_b * jnp.tanh(c_b_n)

            if masked:
                # T was padded up to n_chunks * C; freeze the carries on padded steps.
                vf = (g * C + t) < T_real
                vb = ((n_chunks - 1 - g) * C + (C - 1 - t)) < T_real
                h_f_n = jnp.where(vf, h_f_n, h_f)
                c_f_n = jnp.where(vf, c_f_n, c_f)
                h_b_n = jnp.where(vb, h_b_n, h_b)
                c_b_n = jnp.where(vb, c_b_n, c_b)

            outf_ref[t] = h_f_n.astype(outf_ref.dtype)
            outb_ref[C - 1 - t] = h_b_n.astype(outb_ref.dtype)   # in-kernel time reversal
            return (h_f_n, c_f_n, h_b_n, c_b_n)

        carry0 = (hf_sc[...], cf_sc[...], hb_sc[...], cb_sc[...])
        h_f, c_f, h_b, c_b = lax.fori_loop(0, C, step, carry0)

        # Persist the carry across grid steps (once per chunk, not per step).
        hf_sc[...] = h_f
        cf_sc[...] = c_f
        hb_sc[...] = h_b
        cb_sc[...] = c_b
        hN_ref[...] = jnp.concatenate([h_f, h_b], axis=-1)
        cN_ref[...] = jnp.concatenate([c_f, c_b], axis=-1)
    return kernel


def _bilstm_recurrence(gx, whh_f, whh_b, H, C, n_chunks, T_real, masked, merged,
                       out_dtype, vmem_cap):
    G4 = 4 * H
    T_pad = n_chunks * C
    if merged:
        B = int(gx.shape[1])
        gx_args = (gx, gx)                       # one stored array, two DMA streams
        gx_specs = [
            pl.BlockSpec((C, B, G4), lambda g: (g, 0, 0)),               # fwd lanes [0,4H)
            pl.BlockSpec((C, B, G4), lambda g: (n_chunks - 1 - g, 0, 1)),  # bwd lanes [4H,8H), reversed time
        ]
        gx_bytes = 2 * C * B * G4 * int(gx.dtype.itemsize)
    else:
        gxf, gxb = gx
        B = int(gxf.shape[1])
        gx_args = (gxf, gxb)
        gx_specs = [
            pl.BlockSpec((C, B, G4), lambda g: (g, 0, 0)),
            pl.BlockSpec((C, B, G4), lambda g: (n_chunks - 1 - g, 0, 0)),
        ]
        gx_bytes = 2 * C * B * G4 * int(gxf.dtype.itemsize)

    out_itemsize = 2 if out_dtype == jnp.bfloat16 else 4
    block_bytes = (gx_bytes
                   + 2 * H * G4 * int(whh_f.dtype.itemsize)
                   + 2 * C * B * H * out_itemsize
                   + 4 * B * 2 * H * 4)

    out_shape = (
        jax.ShapeDtypeStruct((T_pad, B, H), out_dtype),       # forward hiddens
        jax.ShapeDtypeStruct((T_pad, B, H), out_dtype),       # backward hiddens (time order)
        jax.ShapeDtypeStruct((B, 2 * H), jnp.float32),        # final hidden [fwd | bwd]
        jax.ShapeDtypeStruct((B, 2 * H), jnp.float32),        # final cell   [fwd | bwd]
    )
    grid_spec = pltpu.PrefetchScalarGridSpec(
        num_scalar_prefetch=0,
        grid=(n_chunks,),
        in_specs=gx_specs + [
            pl.BlockSpec((H, G4), lambda g: (0, 0)),
            pl.BlockSpec((H, G4), lambda g: (0, 0)),
        ],
        out_specs=(
            pl.BlockSpec((C, B, H), lambda g: (g, 0, 0)),
            pl.BlockSpec((C, B, H), lambda g: (n_chunks - 1 - g, 0, 0)),
            pl.BlockSpec((B, 2 * H), lambda g: (0, 0)),
            pl.BlockSpec((B, 2 * H), lambda g: (0, 0)),
        ),
        scratch_shapes=[pltpu.VMEM((B, H), jnp.float32)] * 4,
    )
    kernel = _make_bilstm_kernel(C, n_chunks, T_real, masked)
    return pl.pallas_call(
        kernel,
        out_shape=out_shape,
        grid_spec=grid_spec,
        compiler_params=pltpu.CompilerParams(
            dimension_semantics=("arbitrary",),
            vmem_limit_bytes=_vmem_limit(block_bytes, vmem_cap)),
    )(*gx_args, whh_f, whh_b)


# ---------------------------------------------------------------------------
# Parameters (PyTorch nn.LSTM layout) and one-time preparation
# ---------------------------------------------------------------------------

def init_encoder_params(key, input_dim, hidden_dim, num_layers):
    """Deterministic init matching nn.LSTM parameter shapes (bidirectional)."""
    k = 1.0 / jnp.sqrt(hidden_dim)
    params = []
    in_dim = input_dim
    for _ in range(num_layers):
        layer = []
        for _direction in range(2):
            key, k1, k2, k3, k4 = jax.random.split(key, 5)
            w_ih = jax.random.uniform(k1, (4 * hidden_dim, in_dim), jnp.float32, -k, k)
            w_hh = jax.random.uniform(k2, (4 * hidden_dim, hidden_dim), jnp.float32, -k, k)
            b_ih = jax.random.uniform(k3, (4 * hidden_dim,), jnp.float32, -k, k)
            b_hh = jax.random.uniform(k4, (4 * hidden_dim,), jnp.float32, -k, k)
            layer.append((w_ih, w_hh, b_ih, b_hh))
        params.append(tuple(layer))
        in_dim = 2 * hidden_dim
    return params


def prepare_encoder_params(raw_params, compute_dtype=jnp.bfloat16):
    """Transpose, fold biases, bf16 cast; concat W_ih across directions (D, 8H);
    for layers > 0 split the (2H, 8H) W_ih into two (H, 8H) halves (fwd/bwd input)."""
    prepared = []
    for li, (fwd, bwd) in enumerate(raw_params):
        w_ih_f, w_hh_f, b_ih_f, b_hh_f = fwd
        w_ih_b, w_hh_b, b_ih_b, b_hh_b = bwd
        H = w_hh_f.shape[1]
        wx_full = jnp.concatenate([jnp.transpose(w_ih_f), jnp.transpose(w_ih_b)],
                                  axis=1)                         # (in_dim, 8H)
        if li > 0:
            wx = (wx_full[:H].astype(compute_dtype),              # applied to outf
                  wx_full[H:].astype(compute_dtype))              # applied to outb
        else:
            wx = (wx_full.astype(compute_dtype),)
        bx = jnp.concatenate([b_ih_f + b_hh_f, b_ih_b + b_hh_b]
                             ).reshape(1, 8 * H).astype(jnp.float32)
        prepared.append(dict(
            wx=wx, bx=bx,
            whh_f=jnp.transpose(w_hh_f).astype(compute_dtype),    # (H, 4H)
            whh_b=jnp.transpose(w_hh_b).astype(compute_dtype),
        ))
    return prepared


# ---------------------------------------------------------------------------
# Forward pass (mirrors Encoder.forward)
# ---------------------------------------------------------------------------

def encoder_forward(x, params, time_chunk=None):
    """x: (B, T, D) float32 (batch_first).

    Returns (output (B, T, 2H), (hidden (1, B, 2H), cell (1, B, 2H))) where
    hidden/cell are the concatenated layer-0 forward/backward final states,
    exactly as hidden[0], hidden[1] in the PyTorch module.
    """
    B0, T0, _ = x.shape
    num_layers = len(params)
    H = int(params[0]["whh_f"].shape[0])
    vmem_cap = _vmem_capacity()

    B = ((B0 + 7) // 8) * 8                       # pad batch to sublane multiple
    C, n_chunks, T_pad = _pick_rec_chunk(T0, B, H, vmem_cap, time_chunk)
    masked = (T_pad != T0)
    merged = (4 * H) % 128 == 0                   # lane-blocked single-Gx path

    x_tbd = jnp.transpose(x, (1, 0, 2)).astype(jnp.float32)       # (T, B, D)
    if T_pad != T0 or B != B0:
        x_tbd = jnp.pad(x_tbd, ((0, T_pad - T0), (0, B - B0), (0, 0)))

    xs = (x_tbd,)
    h0 = c0 = None
    for li, lp in enumerate(params):
        ws = lp["wx"]
        C_proj, n_proj = _pick_proj_chunk(C, n_chunks, B, H, xs, vmem_cap)
        gx = _input_projection(xs, ws, lp["bx"], H, C_proj, n_proj, merged, vmem_cap)
        out_dtype = jnp.float32 if li == num_layers - 1 else jnp.bfloat16
        outf, outb, hN, cN = _bilstm_recurrence(
            gx, lp["whh_f"], lp["whh_b"], H, C, n_chunks, T0, masked, merged,
            out_dtype, vmem_cap)
        xs = (outf, outb)                          # no inter-layer concat
        if li == 0:
            h0, c0 = hN, cN

    outf, outb = xs
    output = jnp.concatenate([outf[:T0, :B0], outb[:T0, :B0]], axis=-1)
    output = jnp.transpose(output, (1, 0, 2)).astype(jnp.float32)  # (B, T, 2H)
    return output, (h0[:B0][None], c0[:B0][None])


# ---------------------------------------------------------------------------
# Pure-JAX reference (for a numeric self-check)
# ---------------------------------------------------------------------------

def _encoder_ref(x, raw_params):
    """Mirrors nn.LSTM(bidirectional=True), with the same bf16 rounding of
    x / weights / G_x as the kernels so the comparison is tight."""
    rnd = lambda v: v.astype(jnp.bfloat16).astype(jnp.float32)
    x_tbd = jnp.transpose(x, (1, 0, 2)).astype(jnp.float32)
    layer_in = x_tbd
    h0 = c0 = None
    for li, (fwd_p, bwd_p) in enumerate(raw_params):
        T, B, _ = layer_in.shape
        outs, finals = [], []
        for d, (w_ih, w_hh, b_ih, b_hh) in enumerate((fwd_p, bwd_p)):
            H = w_hh.shape[1]
            wx = rnd(jnp.transpose(w_ih))
            wh = rnd(jnp.transpose(w_hh))
            b = (b_ih + b_hh).astype(jnp.float32)
            xs = layer_in if d == 0 else layer_in[::-1]

            def step(carry, x_t, wx=wx, wh=wh, b=b, H=H):
                h, c = carry
                g = rnd(rnd(x_t) @ wx + b) + rnd(h) @ wh
                i = jax.nn.sigmoid(g[:, 0 * H:1 * H])
                f = jax.nn.sigmoid(g[:, 1 * H:2 * H])
                gg = jnp.tanh(g[:, 2 * H:3 * H])
                o = jax.nn.sigmoid(g[:, 3 * H:4 * H])
                c = f * c + i * gg
                h = o * jnp.tanh(c)
                return (h, c), h

            init = (jnp.zeros((B, H), jnp.float32), jnp.zeros((B, H), jnp.float32))
            (hN, cN), hs = lax.scan(step, init, xs)
            if d == 1:
                hs = hs[::-1]
            outs.append(hs)
            finals.append((hN, cN))
        layer_in = jnp.concatenate(outs, axis=-1)
        if li == 0:
            h0 = jnp.concatenate([finals[0][0], finals[1][0]], axis=1)[None]
            c0 = jnp.concatenate([finals[0][1], finals[1][1]], axis=1)[None]
    return jnp.transpose(layer_in, (1, 0, 2)), (h0, c0)


# ---------------------------------------------------------------------------
# demo / self-test
# ---------------------------------------------------------------------------

if __name__ == "__main__":
    B, T, D, H = 2, 8, 16, 32
    NUM_LAYERS = 2   # exercises the split-W_ih (no inter-layer concat) path too
    key = jax.random.PRNGKey(0)
    key, pkey, xkey = jax.random.split(key, 3)

    raw_params = init_encoder_params(pkey, D, H, NUM_LAYERS)
    params = prepare_encoder_params(raw_params)
    x = jax.random.normal(xkey, (B, T, D), jnp.float32)

    # time_chunk=3 with T=8 -> 3 chunks, padded T=9 with a masked tail:
    # exercises the streamed recurrence, tail-masking and batch-padding paths.
    fwd = jax.jit(lambda xx, pp: encoder_forward(xx, pp, time_chunk=3))
    output, (hidden, cell) = fwd(x, params)
    jax.block_until_ready((output, hidden, cell))

    assert output.shape == (B, T, 2 * H)
    assert hidden.shape == (1, B, 2 * H)
    assert cell.shape == (1, B, 2 * H)
    assert bool(jnp.isfinite(output).all())

    out_ref, (hid_ref, cell_ref) = _encoder_ref(x, raw_params)
    assert float(jnp.max(jnp.abs(output - out_ref))) < 2e-2
    assert float(jnp.max(jnp.abs(hidden - hid_ref))) < 1e-2
    assert float(jnp.max(jnp.abs(cell - cell_ref))) < 2e-2

    print("KERNEL_OK")
</pallas_src>

<mosaic_0001>
module attributes {stable_mosaic.version = 11 : i64} {
  func.func @kernel(%arg0: i32, %arg1: memref<3x8x128xbf16, #tpu.memory_space<vmem>>, %arg2: memref<3x8x128xbf16, #tpu.memory_space<vmem>>, %arg3: memref<32x128xbf16, #tpu.memory_space<vmem>>, %arg4: memref<32x128xbf16, #tpu.memory_space<vmem>>, %arg5: memref<3x8x32xbf16, #tpu.memory_space<vmem>>, %arg6: memref<3x8x32xbf16, #tpu.memory_space<vmem>>, %arg7: memref<8x64xf32, #tpu.memory_space<vmem>>, %arg8: memref<8x64xf32, #tpu.memory_space<vmem>>, %arg9: memref<8x32xf32, #tpu.memory_space<vmem>>, %arg10: memref<8x32xf32, #tpu.memory_space<vmem>>, %arg11: memref<8x32xf32, #tpu.memory_space<vmem>>, %arg12: memref<8x32xf32, #tpu.memory_space<vmem>>) attributes {dimension_semantics = [#tpu.dimension_semantics<arbitrary>], iteration_bounds = array<i64: 3>, scalar_prefetch = 0 : i64, scratch_operands = 4 : i64, tpu.core_type = #tpu.core_type<tc>, window_params = [{transform_indices = @transform_0, window_bounds = array<i64: 3, 8, 128>}, {transform_indices = @transform_1, window_bounds = array<i64: 3, 8, 128>}, {pipeline_mode = #tpu.pipeline_mode<synchronous>, transform_indices = @transform_2, window_bounds = array<i64: 32, 128>}, {pipeline_mode = #tpu.pipeline_mode<synchronous>, transform_indices = @transform_3, window_bounds = array<i64: 32, 128>}, {transform_indices = @transform_4, window_bounds = array<i64: 3, 8, 32>}, {transform_indices = @transform_5, window_bounds = array<i64: 3, 8, 32>}, {pipeline_mode = #tpu.pipeline_mode<synchronous>, transform_indices = @transform_6, window_bounds = array<i64: 8, 64>}, {pipeline_mode = #tpu.pipeline_mode<synchronous>, transform_indices = @transform_7, window_bounds = array<i64: 8, 64>}]} {
    %c0_i32 = arith.constant 0 : i32
    %0 = arith.cmpi eq, %arg0, %c0_i32 : i32
    %1 = arith.extui %0 : i1 to i32
    %c0_i32_0 = arith.constant 0 : i32
    %2 = arith.cmpi ne, %1, %c0_i32_0 : i32
    scf.if %2 {
      %cst = arith.constant 0.000000e+00 : f32
      %17 = vector.broadcast %cst : f32 to vector<8x32xf32>
      %c0_22 = arith.constant 0 : index
      %c0_23 = arith.constant 0 : index
      %18 = vector.load %arg9[%c0_22, %c0_23] : memref<8x32xf32, #tpu.memory_space<vmem>>, vector<8x32xf32>
      tpu.vector_store %arg9[%c0_22, %c0_23], %17 {strides = array<i32>} : memref<8x32xf32, #tpu.memory_space<vmem>>, vector<8x32xf32>,
      %cst_24 = arith.constant 0.000000e+00 : f32
      %19 = vector.broadcast %cst_24 : f32 to vector<8x32xf32>
      %c0_25 = arith.constant 0 : index
      %c0_26 = arith.constant 0 : index
      %20 = vector.load %arg10[%c0_25, %c0_26] : memref<8x32xf32, #tpu.memory_space<vmem>>, vector<8x32xf32>
      tpu.vector_store %arg10[%c0_25, %c0_26], %19 {strides = array<i32>} : memref<8x32xf32, #tpu.memory_space<vmem>>, vector<8x32xf32>,
      %cst_27 = arith.constant 0.000000e+00 : f32
      %21 = vector.broadcast %cst_27 : f32 to vector<8x32xf32>
      %c0_28 = arith.constant 0 : index
      %c0_29 = arith.constant 0 : index
      %22 = vector.load %arg11[%c0_28, %c0_29] : memref<8x32xf32, #tpu.memory_space<vmem>>, vector<8x32xf32>
      tpu.vector_store %arg11[%c0_28, %c0_29], %21 {strides = array<i32>} : memref<8x32xf32, #tpu.memory_space<vmem>>, vector<8x32xf32>,
      %cst_30 = arith.constant 0.000000e+00 : f32
      %23 = vector.broadcast %cst_30 : f32 to vector<8x32xf32>
      %c0_31 = arith.constant 0 : index
      %c0_32 = arith.constant 0 : index
      %24 = vector.load %arg12[%c0_31, %c0_32] : memref<8x32xf32, #tpu.memory_space<vmem>>, vector<8x32xf32>
      tpu.vector_store %arg12[%c0_31, %c0_32], %23 {strides = array<i32>} : memref<8x32xf32, #tpu.memory_space<vmem>>, vector<8x32xf32>,
    } else {
    }
    %c0 = arith.constant 0 : index
    %c0_1 = arith.constant 0 : index
    %3 = vector.load %arg9[%c0, %c0_1] : memref<8x32xf32, #tpu.memory_space<vmem>>, vector<8x32xf32>
    %c0_2 = arith.constant 0 : index
    %c0_3 = arith.constant 0 : index
    %4 = vector.load %arg10[%c0_2, %c0_3] : memref<8x32xf32, #tpu.memory_space<vmem>>, vector<8x32xf32>
    %c0_4 = arith.constant 0 : index
    %c0_5 = arith.constant 0 : index
    %5 = vector.load %arg11[%c0_4, %c0_5] : memref<8x32xf32, #tpu.memory_space<vmem>>, vector<8x32xf32>
    %c0_6 = arith.constant 0 : index
    %c0_7 = arith.constant 0 : index
    %6 = vector.load %arg12[%c0_6, %c0_7] : memref<8x32xf32, #tpu.memory_space<vmem>>, vector<8x32xf32>
    %c0_i32_8 = arith.constant 0 : i32
    %c3_i32 = arith.constant 3 : i32
    %7 = arith.addi %c0_i32_8, %c3_i32 : i32
    %c1_i32 = arith.constant 1 : i32
    %8:4 = scf.for %arg13 = %c0_i32_8 to %7 step %c1_i32 iter_args(%arg14 = %3, %arg15 = %4, %arg16 = %5, %arg17 = %6) -> (vector<8x32xf32>, vector<8x32xf32>, vector<8x32xf32>, vector<8x32xf32>)  : i32 {
      %17 = arith.truncf %arg14 : vector<8x32xf32> to vector<8x32xbf16>
      %c0_22 = arith.constant 0 : index
      %c0_23 = arith.constant 0 : index
      %18 = vector.load %arg3[%c0_22, %c0_23] : memref<32x128xbf16, #tpu.memory_space<vmem>>, vector<32x128xbf16>
      %cst = arith.constant dense<0.000000e+00> : vector<8x128xf32>
      %19 = tpu.matmul %17, %18, %cst {dimension_numbers = #tpu.dot_dimension_numbers<[1], [0], [0], [1], [0, 0, 1, 1], [], []>} : vector<8x32xbf16>, vector<32x128xbf16>, vector<8x128xf32> -> vector<8x128xf32>
      %20 = arith.truncf %arg16 : vector<8x32xf32> to vector<8x32xbf16>
      %c0_24 = arith.constant 0 : index
      %c0_25 = arith.constant 0 : index
      %21 = vector.load %arg4[%c0_24, %c0_25] : memref<32x128xbf16, #tpu.memory_space<vmem>>, vector<32x128xbf16>
      %cst_26 = arith.constant dense<0.000000e+00> : vector<8x128xf32>
      %22 = tpu.matmul %20, %21, %cst_26 {dimension_numbers = #tpu.dot_dimension_numbers<[1], [0], [0], [1], [0, 0, 1, 1], [], []>} : vector<8x32xbf16>, vector<32x128xbf16>, vector<8x128xf32> -> vector<8x128xf32>
      %23 = arith.index_cast %arg13 : i32 to index
      %c0_27 = arith.constant 0 : index
      %c0_28 = arith.constant 0 : index
      %24 = vector.load %arg1[%23, %c0_27, %c0_28] : memref<3x8x128xbf16, #tpu.memory_space<vmem>>, vector<1x8x128xbf16>
      %25 = vector.shape_cast %24 : vector<1x8x128xbf16> to vector<8x128xbf16>
      %26 = arith.extf %25 : vector<8x128xbf16> to vector<8x128xf32>
      %27 = arith.addf %19, %26 : vector<8x128xf32>
      %c2_i32 = arith.constant 2 : i32
      %28 = arith.subi %c2_i32, %arg13 : i32
      %29 = arith.index_cast %28 : i32 to index
      %c0_29 = arith.constant 0 : index
      %c0_30 = arith.constant 0 : index
      %30 = vector.load %arg2[%29, %c0_29, %c0_30] : memref<3x8x128xbf16, #tpu.memory_space<vmem>>, vector<1x8x128xbf16>
      %31 = vector.shape_cast %30 : vector<1x8x128xbf16> to vector<8x128xbf16>
      %32 = arith.extf %31 : vector<8x128xbf16> to vector<8x128xf32>
      %33 = arith.addf %22, %32 : vector<8x128xf32>
      %34 = vector.extract_strided_slice %27 {offsets = [0, 0], sizes = [8, 32], strides = [1, 1]} : vector<8x128xf32> to vector<8x32xf32>
      %35 = arith.negf %34 : vector<8x32xf32>
      %36 = math.exp %35 : vector<8x32xf32>
      %cst_31 = arith.constant 1.000000e+00 : f32
      %37 = vector.broadcast %cst_31 : f32 to vector<8x32xf32>
      %38 = arith.addf %37, %36 : vector<8x32xf32>
      %39 = arith.divf %37, %38 : vector<8x32xf32>
      %40 = vector.extract_strided_slice %27 {offsets = [0, 32], sizes = [8, 32], strides = [1, 1]} : vector<8x128xf32> to vector<8x32xf32>
      %41 = arith.negf %40 : vector<8x32xf32>
      %42 = math.exp %41 : vector<8x32xf32>
      %cst_32 = arith.constant 1.000000e+00 : f32
      %43 = vector.broadcast %cst_32 : f32 to vector<8x32xf32>
      %44 = arith.addf %43, %42 : vector<8x32xf32>
      %45 = arith.divf %43, %44 : vector<8x32xf32>
      %46 = vector.extract_strided_slice %27 {offsets = [0, 64], sizes = [8, 32], strides = [1, 1]} : vector<8x128xf32> to vector<8x32xf32>
      %47 = math.tanh %46 : vector<8x32xf32>
      %48 = vector.extract_strided_slice %27 {offsets = [0, 96], sizes = [8, 32], strides = [1, 1]} : vector<8x128xf32> to vector<8x32xf32>
      %49 = arith.negf %48 : vector<8x32xf32>
      %50 = math.exp %49 : vector<8x32xf32>
      %cst_33 = arith.constant 1.000000e+00 : f32
      %51 = vector.broadcast %cst_33 : f32 to vector<8x32xf32>
      %52 = arith.addf %51, %50 : vector<8x32xf32>
      %53 = arith.divf %51, %52 : vector<8x32xf32>
      %54 = vector.extract_strided_slice %33 {offsets = [0, 0], sizes = [8, 32], strides = [1, 1]} : vector<8x128xf32> to vector<8x32xf32>
      %55 = arith.negf %54 : vector<8x32xf32>
      %56 = math.exp %55 : vector<8x32xf32>
      %cst_34 = arith.constant 1.000000e+00 : f32
      %57 = vector.broadcast %cst_34 : f32 to vector<8x32xf32>
      %58 = arith.addf %57, %56 : vector<8x32xf32>
      %59 = arith.divf %57, %58 : vector<8x32xf32>
      %60 = vector.extract_strided_slice %33 {offsets = [0, 32], sizes = [8, 32], strides = [1, 1]} : vector<8x128xf32> to vector<8x32xf32>
      %61 = arith.negf %60 : vector<8x32xf32>
      %62 = math.exp %61 : vector<8x32xf32>
      %cst_35 = arith.constant 1.000000e+00 : f32
      %63 = vector.broadcast %cst_35 : f32 to vector<8x32xf32>
      %64 = arith.addf %63, %62 : vector<8x32xf32>
      %65 = arith.divf %63, %64 : vector<8x32xf32>
      %66 = vector.extract_strided_slice %33 {offsets = [0, 64], sizes = [8, 32], strides = [1, 1]} : vector<8x128xf32> to vector<8x32xf32>
      %67 = math.tanh %66 : vector<8x32xf32>
      %68 = vector.extract_strided_slice %33 {offsets = [0, 96], sizes = [8, 32], strides = [1, 1]} : vector<8x128xf32> to vector<8x32xf32>
      %69 = arith.negf %68 : vector<8x32xf32>
      %70 = math.exp %69 : vector<8x32xf32>
      %cst_36 = arith.constant 1.000000e+00 : f32
      %71 = vector.broadcast %cst_36 : f32 to vector<8x32xf32>
      %72 = arith.addf %71, %70 : vector<8x32xf32>
      %73 = arith.divf %71, %72 : vector<8x32xf32>
      %74 = arith.mulf %45, %arg15 : vector<8x32xf32>
      %75 = arith.mulf %39, %47 : vector<8x32xf32>
      %76 = arith.addf %74, %75 : vector<8x32xf32>
      %77 = arith.mulf %65, %arg17 : vector<8x32xf32>
      %78 = arith.mulf %59, %67 : vector<8x32xf32>
      %79 = arith.addf %77, %78 : vector<8x32xf32>
      %80 = math.tanh %76 : vector<8x32xf32>
      %81 = arith.mulf %53, %80 : vector<8x32xf32>
      %82 = math.tanh %79 : vector<8x32xf32>
      %83 = arith.mulf %73, %82 : vector<8x32xf32>
      %c3_i32_37 = arith.constant 3 : i32
      %84 = arith.muli %arg0, %c3_i32_37 : i32
      %85 = arith.addi %84, %arg13 : i32
      %c8_i32 = arith.constant 8 : i32
      %86 = arith.cmpi slt, %85, %c8_i32 : i32
      %c2_i32_38 = arith.constant 2 : i32
      %87 = arith.subi %c2_i32_38, %arg0 : i32
      %c3_i32_39 = arith.constant 3 : i32
      %88 = arith.muli %87, %c3_i32_39 : i32
      %c2_i32_40 = arith.constant 2 : i32
      %89 = arith.subi %c2_i32_40, %arg13 : i32
      %90 = arith.addi %88, %89 : i32
      %c8_i32_41 = arith.constant 8 : i32
      %91 = arith.cmpi slt, %90, %c8_i32_41 : i32
      %92 = arith.select %86, %81, %arg14 : vector<8x32xf32>
      %93 = arith.select %86, %76, %arg15 : vector<8x32xf32>
      %94 = arith.select %91, %83, %arg16 : vector<8x32xf32>
      %95 = arith.select %91, %79, %arg17 : vector<8x32xf32>
      %96 = arith.truncf %92 : vector<8x32xf32> to vector<8x32xbf16>
      %97 = arith.index_cast %arg13 : i32 to index
      %c0_42 = arith.constant 0 : index
      %c0_43 = arith.constant 0 : index
      %98 = vector.load %arg5[%97, %c0_42, %c0_43] : memref<3x8x32xbf16, #tpu.memory_space<vmem>>, vector<1x8x32xbf16>
      %99 = vector.shape_cast %98 : vector<1x8x32xbf16> to vector<8x32xbf16>
      %100 = vector.shape_cast %96 : vector<8x32xbf16> to vector<1x8x32xbf16>
      tpu.vector_store %arg5[%97, %c0_42, %c0_43], %100 {strides = array<i32>} : memref<3x8x32xbf16, #tpu.memory_space<vmem>>, vector<1x8x32xbf16>,
      %101 = arith.truncf %94 : vector<8x32xf32> to vector<8x32xbf16>
      %c2_i32_44 = arith.constant 2 : i32
      %102 = arith.subi %c2_i32_44, %arg13 : i32
      %103 = arith.index_cast %102 : i32 to index
      %c0_45 = arith.constant 0 : index
      %c0_46 = arith.constant 0 : index
      %104 = vector.load %arg6[%103, %c0_45, %c0_46] : memref<3x8x32xbf16, #tpu.memory_space<vmem>>, vector<1x8x32xbf16>
      %105 = vector.shape_cast %104 : vector<1x8x32xbf16> to vector<8x32xbf16>
      %106 = vector.shape_cast %101 : vector<8x32xbf16> to vector<1x8x32xbf16>
      tpu.vector_store %arg6[%103, %c0_45, %c0_46], %106 {strides = array<i32>} : memref<3x8x32xbf16, #tpu.memory_space<vmem>>, vector<1x8x32xbf16>,
      scf.yield %92, %93, %94, %95 : vector<8x32xf32>, vector<8x32xf32>, vector<8x32xf32>, vector<8x32xf32>
    }
    %c3_i32_9 = arith.constant 3 : i32
    %c0_10 = arith.constant 0 : index
    %c0_11 = arith.constant 0 : index
    %9 = vector.load %arg9[%c0_10, %c0_11] : memref<8x32xf32, #tpu.memory_space<vmem>>, vector<8x32xf32>
    tpu.vector_store %arg9[%c0_10, %c0_11], %8#0 {strides = array<i32>} : memref<8x32xf32, #tpu.memory_space<vmem>>, vector<8x32xf32>,
    %c0_12 = arith.constant 0 : index
    %c0_13 = arith.constant 0 : index
    %10 = vector.load %arg10[%c0_12, %c0_13] : memref<8x32xf32, #tpu.memory_space<vmem>>, vector<8x32xf32>
    tpu.vector_store %arg10[%c0_12, %c0_13], %8#1 {strides = array<i32>} : memref<8x32xf32, #tpu.memory_space<vmem>>, vector<8x32xf32>,
    %c0_14 = arith.constant 0 : index
    %c0_15 = arith.constant 0 : index
    %11 = vector.load %arg11[%c0_14, %c0_15] : memref<8x32xf32, #tpu.memory_space<vmem>>, vector<8x32xf32>
    tpu.vector_store %arg11[%c0_14, %c0_15], %8#2 {strides = array<i32>} : memref<8x32xf32, #tpu.memory_space<vmem>>, vector<8x32xf32>,
    %c0_16 = arith.constant 0 : index
    %c0_17 = arith.constant 0 : index
    %12 = vector.load %arg12[%c0_16, %c0_17] : memref<8x32xf32, #tpu.memory_space<vmem>>, vector<8x32xf32>
    tpu.vector_store %arg12[%c0_16, %c0_17], %8#3 {strides = array<i32>} : memref<8x32xf32, #tpu.memory_space<vmem>>, vector<8x32xf32>,
    %13 = tpu.concatenate %8#0, %8#2 in 1 : vector<8x32xf32>, vector<8x32xf32> -> vector<8x64xf32>
    %c0_18 = arith.constant 0 : index
    %c0_19 = arith.constant 0 : index
    %14 = vector.load %arg7[%c0_18, %c0_19] : memref<8x64xf32, #tpu.memory_space<vmem>>, vector<8x64xf32>
    tpu.vector_store %arg7[%c0_18, %c0_19], %13 {strides = array<i32>} : memref<8x64xf32, #tpu.memory_space<vmem>>, vector<8x64xf32>,
    %15 = tpu.concatenate %8#1, %8#3 in 1 : vector<8x32xf32>, vector<8x32xf32> -> vector<8x64xf32>
    %c0_20 = arith.constant 0 : index
    %c0_21 = arith.constant 0 : index
    %16 = vector.load %arg8[%c0_20, %c0_21] : memref<8x64xf32, #tpu.memory_space<vmem>>, vector<8x64xf32>
    tpu.vector_store %arg8[%c0_20, %c0_21], %15 {strides = array<i32>} : memref<8x64xf32, #tpu.memory_space<vmem>>, vector<8x64xf32>,
    return
  }
  func.func @transform_0(%arg0: i32) -> (i32, i32, i32) {
    %c0_i32 = arith.constant 0 : i32
    %c0_i32_0 = arith.constant 0 : i32
    %c0_i32_1 = arith.constant 0 : i32
    return %arg0, %c0_i32, %c0_i32_0 : i32, i32, i32
  }
  func.func @transform_1(%arg0: i32) -> (i32, i32, i32) {
    %c2_i32 = arith.constant 2 : i32
    %0 = arith.subi %c2_i32, %arg0 : i32
    %c0_i32 = arith.constant 0 : i32
    %c1_i32 = arith.constant 1 : i32
    %c0_i32_0 = arith.constant 0 : i32
    return %0, %c0_i32, %c1_i32 : i32, i32, i32
  }
  func.func @transform_2(%arg0: i32) -> (i32, i32) {
    %c0_i32 = arith.constant 0 : i32
    %c0_i32_0 = arith.constant 0 : i32
    %c0_i32_1 = arith.constant 0 : i32
    return %c0_i32, %c0_i32_0 : i32, i32
  }
  func.func @transform_3(%arg0: i32) -> (i32, i32) {
    %c0_i32 = arith.constant 0 : i32
    %c0_i32_0 = arith.constant 0 : i32
    %c0_i32_1 = arith.constant 0 : i32
    return %c0_i32, %c0_i32_0 : i32, i32
  }
  func.func @transform_4(%arg0: i32) -> (i32, i32, i32) {
    %c0_i32 = arith.constant 0 : i32
    %c0_i32_0 = arith.constant 0 : i32
    %c0_i32_1 = arith.constant 0 : i32
    return %arg0, %c0_i32, %c0_i32_0 : i32, i32, i32
  }
  func.func @transform_5(%arg0: i32) -> (i32, i32, i32) {
    %c2_i32 = arith.constant 2 : i32
    %0 = arith.subi %c2_i32, %arg0 : i32
    %c0_i32 = arith.constant 0 : i32
    %c0_i32_0 = arith.constant 0 : i32
    %c0_i32_1 = arith.constant 0 : i32
    return %0, %c0_i32, %c0_i32_0 : i32, i32, i32
  }
  func.func @transform_6(%arg0: i32) -> (i32, i32) {
    %c0_i32 = arith.constant 0 : i32
    %c0_i32_0 = arith.constant 0 : i32
    %c0_i32_1 = arith.constant 0 : i32
    return %c0_i32, %c0_i32_0 : i32, i32
  }
  func.func @transform_7(%arg0: i32) -> (i32, i32) {
    %c0_i32 = arith.constant 0 : i32
    %c0_i32_0 = arith.constant 0 : i32
    %c0_i32_1 = arith.constant 0 : i32
    return %c0_i32, %c0_i32_0 : i32, i32
  }
}

module attributes {stable_mosaic.version = 11 : i64} {
  func.func @kernel(%arg0: i32, %arg1: memref<9x8x16xf32, #tpu.memory_space<vmem>>, %arg2: memref<16x256xbf16, #tpu.memory_space<vmem>>, %arg3: memref<1x256xf32, #tpu.memory_space<vmem>>, %arg4: memref<9x8x256xbf16, #tpu.memory_space<vmem>>) attributes {dimension_semantics = [#tpu.dimension_semantics<parallel>], iteration_bounds = array<i64: 1>, scalar_prefetch = 0 : i64, scratch_operands = 0 : i64, tpu.core_type = #tpu.core_type<tc>, window_params = [{transform_indices = @transform_0, window_bounds = array<i64: 9, 8, 16>}, {pipeline_mode = #tpu.pipeline_mode<synchronous>, transform_indices = @transform_1, window_bounds = array<i64: 16, 256>}, {pipeline_mode = #tpu.pipeline_mode<synchronous>, transform_indices = @transform_2, window_bounds = array<i64: 1, 256>}, {transform_indices = @transform_3, window_bounds = array<i64: 9, 8, 256>}]} {
    %c0 = arith.constant 0 : index
    %c0_0 = arith.constant 0 : index
    %c0_1 = arith.constant 0 : index
    %0 = vector.load %arg1[%c0, %c0_0, %c0_1] : memref<9x8x16xf32, #tpu.memory_space<vmem>>, vector<9x8x16xf32>
    %1 = vector.shape_cast %0 : vector<9x8x16xf32> to vector<72x16xf32>
    %2 = arith.truncf %1 : vector<72x16xf32> to vector<72x16xbf16>
    %c0_2 = arith.constant 0 : index
    %c0_3 = arith.constant 0 : index
    %3 = vector.load %arg2[%c0_2, %c0_3] : memref<16x256xbf16, #tpu.memory_space<vmem>>, vector<16x256xbf16>
    %cst = arith.constant dense<0.000000e+00> : vector<72x256xf32>
    %4 = tpu.matmul %2, %3, %cst {dimension_numbers = #tpu.dot_dimension_numbers<[1], [0], [0], [1], [0, 0, 1, 1], [], []>} : vector<72x16xbf16>, vector<16x256xbf16>, vector<72x256xf32> -> vector<72x256xf32>
    %c0_4 = arith.constant 0 : index
    %c0_5 = arith.constant 0 : index
    %5 = vector.load %arg3[%c0_4, %c0_5] : memref<1x256xf32, #tpu.memory_space<vmem>>, vector<1x256xf32>
    %6 = vector.broadcast %5 : vector<1x256xf32> to vector<72x256xf32>
    %7 = arith.addf %4, %6 : vector<72x256xf32>
    %8 = vector.shape_cast %7 : vector<72x256xf32> to vector<9x8x256xf32>
    %9 = arith.truncf %8 : vector<9x8x256xf32> to vector<9x8x256xbf16>
    %c0_6 = arith.constant 0 : index
    %c0_7 = arith.constant 0 : index
    %c0_8 = arith.constant 0 : index
    %10 = vector.load %arg4[%c0_6, %c0_7, %c0_8] : memref<9x8x256xbf16, #tpu.memory_space<vmem>>, vector<9x8x256xbf16>
    tpu.vector_store %arg4[%c0_6, %c0_7, %c0_8], %9 {strides = array<i32>} : memref<9x8x256xbf16, #tpu.memory_space<vmem>>, vector<9x8x256xbf16>,
    return
  }
  func.func @transform_0(%arg0: i32) -> (i32, i32, i32) {
    %c0_i32 = arith.constant 0 : i32
    %c0_i32_0 = arith.constant 0 : i32
    %c0_i32_1 = arith.constant 0 : i32
    return %arg0, %c0_i32, %c0_i32_0 : i32, i32, i32
  }
  func.func @transform_1(%arg0: i32) -> (i32, i32) {
    %c0_i32 = arith.constant 0 : i32
    %c0_i32_0 = arith.constant 0 : i32
    %c0_i32_1 = arith.constant 0 : i32
    return %c0_i32, %c0_i32_0 : i32, i32
  }
  func.func @transform_2(%arg0: i32) -> (i32, i32) {
    %c0_i32 = arith.constant 0 : i32
    %c0_i32_0 = arith.constant 0 : i32
    %c0_i32_1 = arith.constant 0 : i32
    return %c0_i32, %c0_i32_0 : i32, i32
  }
  func.func @transform_3(%arg0: i32) -> (i32, i32, i32) {
    %c0_i32 = arith.constant 0 : i32
    %c0_i32_0 = arith.constant 0 : i32
    %c0_i32_1 = arith.constant 0 : i32
    return %arg0, %c0_i32, %c0_i32_0 : i32, i32, i32
  }
}

module attributes {stable_mosaic.version = 11 : i64} {
  func.func @kernel(%arg0: i32, %arg1: memref<9x8x32xbf16, #tpu.memory_space<vmem>>, %arg2: memref<9x8x32xbf16, #tpu.memory_space<vmem>>, %arg3: memref<32x256xbf16, #tpu.memory_space<vmem>>, %arg4: memref<32x256xbf16, #tpu.memory_space<vmem>>, %arg5: memref<1x256xf32, #tpu.memory_space<vmem>>, %arg6: memref<9x8x256xbf16, #tpu.memory_space<vmem>>) attributes {dimension_semantics = [#tpu.dimension_semantics<parallel>], iteration_bounds = array<i64: 1>, scalar_prefetch = 0 : i64, scratch_operands = 0 : i64, tpu.core_type = #tpu.core_type<tc>, window_params = [{transform_indices = @transform_0, window_bounds = array<i64: 9, 8, 32>}, {transform_indices = @transform_1, window_bounds = array<i64: 9, 8, 32>}, {pipeline_mode = #tpu.pipeline_mode<synchronous>, transform_indices = @transform_2, window_bounds = array<i64: 32, 256>}, {pipeline_mode = #tpu.pipeline_mode<synchronous>, transform_indices = @transform_3, window_bounds = array<i64: 32, 256>}, {pipeline_mode = #tpu.pipeline_mode<synchronous>, transform_indices = @transform_4, window_bounds = array<i64: 1, 256>}, {transform_indices = @transform_5, window_bounds = array<i64: 9, 8, 256>}]} {
    %c0 = arith.constant 0 : index
    %c0_0 = arith.constant 0 : index
    %c0_1 = arith.constant 0 : index
    %0 = vector.load %arg1[%c0, %c0_0, %c0_1] : memref<9x8x32xbf16, #tpu.memory_space<vmem>>, vector<9x8x32xbf16>
    %1 = vector.shape_cast %0 : vector<9x8x32xbf16> to vector<72x32xbf16>
    %c0_2 = arith.constant 0 : index
    %c0_3 = arith.constant 0 : index
    %2 = vector.load %arg3[%c0_2, %c0_3] : memref<32x256xbf16, #tpu.memory_space<vmem>>, vector<32x256xbf16>
    %cst = arith.constant dense<0.000000e+00> : vector<72x256xf32>
    %3 = tpu.matmul %1, %2, %cst {dimension_numbers = #tpu.dot_dimension_numbers<[1], [0], [0], [1], [0, 0, 1, 1], [], []>} : vector<72x32xbf16>, vector<32x256xbf16>, vector<72x256xf32> -> vector<72x256xf32>
    %c0_4 = arith.constant 0 : index
    %c0_5 = arith.constant 0 : index
    %c0_6 = arith.constant 0 : index
    %4 = vector.load %arg2[%c0_4, %c0_5, %c0_6] : memref<9x8x32xbf16, #tpu.memory_space<vmem>>, vector<9x8x32xbf16>
    %5 = vector.shape_cast %4 : vector<9x8x32xbf16> to vector<72x32xbf16>
    %c0_7 = arith.constant 0 : index
    %c0_8 = arith.constant 0 : index
    %6 = vector.load %arg4[%c0_7, %c0_8] : memref<32x256xbf16, #tpu.memory_space<vmem>>, vector<32x256xbf16>
    %cst_9 = arith.constant dense<0.000000e+00> : vector<72x256xf32>
    %7 = tpu.matmul %5, %6, %cst_9 {dimension_numbers = #tpu.dot_dimension_numbers<[1], [0], [0], [1], [0, 0, 1, 1], [], []>} : vector<72x32xbf16>, vector<32x256xbf16>, vector<72x256xf32> -> vector<72x256xf32>
    %8 = arith.addf %3, %7 : vector<72x256xf32>
    %c0_10 = arith.constant 0 : index
    %c0_11 = arith.constant 0 : index
    %9 = vector.load %arg5[%c0_10, %c0_11] : memref<1x256xf32, #tpu.memory_space<vmem>>, vector<1x256xf32>
    %10 = vector.broadcast %9 : vector<1x256xf32> to vector<72x256xf32>
    %11 = arith.addf %8, %10 : vector<72x256xf32>
    %12 = vector.shape_cast %11 : vector<72x256xf32> to vector<9x8x256xf32>
    %13 = arith.truncf %12 : vector<9x8x256xf32> to vector<9x8x256xbf16>
    %c0_12 = arith.constant 0 : index
    %c0_13 = arith.constant 0 : index
    %c0_14 = arith.constant 0 : index
    %14 = vector.load %arg6[%c0_12, %c0_13, %c0_14] : memref<9x8x256xbf16, #tpu.memory_space<vmem>>, vector<9x8x256xbf16>
    tpu.vector_store %arg6[%c0_12, %c0_13, %c0_14], %13 {strides = array<i32>} : memref<9x8x256xbf16, #tpu.memory_space<vmem>>, vector<9x8x256xbf16>,
    return
  }
  func.func @transform_0(%arg0: i32) -> (i32, i32, i32) {
    %c0_i32 = arith.constant 0 : i32
    %c0_i32_0 = arith.constant 0 : i32
    %c0_i32_1 = arith.constant 0 : i32
    return %arg0, %c0_i32, %c0_i32_0 : i32, i32, i32
  }
  func.func @transform_1(%arg0: i32) -> (i32, i32, i32) {
    %c0_i32 = arith.constant 0 : i32
    %c0_i32_0 = arith.constant 0 : i32
    %c0_i32_1 = arith.constant 0 : i32
    return %arg0, %c0_i32, %c0_i32_0 : i32, i32, i32
  }
  func.func @transform_2(%arg0: i32) -> (i32, i32) {
    %c0_i32 = arith.constant 0 : i32
    %c0_i32_0 = arith.constant 0 : i32
    %c0_i32_1 = arith.constant 0 : i32
    return %c0_i32, %c0_i32_0 : i32, i32
  }
  func.func @transform_3(%arg0: i32) -> (i32, i32) {
    %c0_i32 = arith.constant 0 : i32
    %c0_i32_0 = arith.constant 0 : i32
    %c0_i32_1 = arith.constant 0 : i32
    return %c0_i32, %c0_i32_0 : i32, i32
  }
  func.func @transform_4(%arg0: i32) -> (i32, i32) {
    %c0_i32 = arith.constant 0 : i32
    %c0_i32_0 = arith.constant 0 : i32
    %c0_i32_1 = arith.constant 0 : i32
    return %c0_i32, %c0_i32_0 : i32, i32
  }
  func.func @transform_5(%arg0: i32) -> (i32, i32, i32) {
    %c0_i32 = arith.constant 0 : i32
    %c0_i32_0 = arith.constant 0 : i32
    %c0_i32_1 = arith.constant 0 : i32
    return %arg0, %c0_i32, %c0_i32_0 : i32, i32, i32
  }
}

module attributes {stable_mosaic.version = 11 : i64} {
  func.func @kernel(%arg0: i32, %arg1: memref<3x8x128xbf16, #tpu.memory_space<vmem>>, %arg2: memref<3x8x128xbf16, #tpu.memory_space<vmem>>, %arg3: memref<32x128xbf16, #tpu.memory_space<vmem>>, %arg4: memref<32x128xbf16, #tpu.memory_space<vmem>>, %arg5: memref<3x8x32xf32, #tpu.memory_space<vmem>>, %arg6: memref<3x8x32xf32, #tpu.memory_space<vmem>>, %arg7: memref<8x64xf32, #tpu.memory_space<vmem>>, %arg8: memref<8x64xf32, #tpu.memory_space<vmem>>, %arg9: memref<8x32xf32, #tpu.memory_space<vmem>>, %arg10: memref<8x32xf32, #tpu.memory_space<vmem>>, %arg11: memref<8x32xf32, #tpu.memory_space<vmem>>, %arg12: memref<8x32xf32, #tpu.memory_space<vmem>>) attributes {dimension_semantics = [#tpu.dimension_semantics<arbitrary>], iteration_bounds = array<i64: 3>, scalar_prefetch = 0 : i64, scratch_operands = 4 : i64, tpu.core_type = #tpu.core_type<tc>, window_params = [{transform_indices = @transform_0, window_bounds = array<i64: 3, 8, 128>}, {transform_indices = @transform_1, window_bounds = array<i64: 3, 8, 128>}, {pipeline_mode = #tpu.pipeline_mode<synchronous>, transform_indices = @transform_2, window_bounds = array<i64: 32, 128>}, {pipeline_mode = #tpu.pipeline_mode<synchronous>, transform_indices = @transform_3, window_bounds = array<i64: 32, 128>}, {transform_indices = @transform_4, window_bounds = array<i64: 3, 8, 32>}, {transform_indices = @transform_5, window_bounds = array<i64: 3, 8, 32>}, {pipeline_mode = #tpu.pipeline_mode<synchronous>, transform_indices = @transform_6, window_bounds = array<i64: 8, 64>}, {pipeline_mode = #tpu.pipeline_mode<synchronous>, transform_indices = @transform_7, window_bounds = array<i64: 8, 64>}]} {
    %c0_i32 = arith.constant 0 : i32
    %0 = arith.cmpi eq, %arg0, %c0_i32 : i32
    %1 = arith.extui %0 : i1 to i32
    %c0_i32_0 = arith.constant 0 : i32
    %2 = arith.cmpi ne, %1, %c0_i32_0 : i32
    scf.if %2 {
      %cst = arith.constant 0.000000e+00 : f32
      %17 = vector.broadcast %cst : f32 to vector<8x32xf32>
      %c0_22 = arith.constant 0 : index
      %c0_23 = arith.constant 0 : index
      %18 = vector.load %arg9[%c0_22, %c0_23] : memref<8x32xf32, #tpu.memory_space<vmem>>, vector<8x32xf32>
      tpu.vector_store %arg9[%c0_22, %c0_23], %17 {strides = array<i32>} : memref<8x32xf32, #tpu.memory_space<vmem>>, vector<8x32xf32>,
      %cst_24 = arith.constant 0.000000e+00 : f32
      %19 = vector.broadcast %cst_24 : f32 to vector<8x32xf32>
      %c0_25 = arith.constant 0 : index
      %c0_26 = arith.constant 0 : index
      %20 = vector.load %arg10[%c0_25, %c0_26] : memref<8x32xf32, #tpu.memory_space<vmem>>, vector<8x32xf32>
      tpu.vector_store %arg10[%c0_25, %c0_26], %19 {strides = array<i32>} : memref<8x32xf32, #tpu.memory_space<vmem>>, vector<8x32xf32>,
      %cst_27 = arith.constant 0.000000e+00 : f32
      %21 = vector.broadcast %cst_27 : f32 to vector<8x32xf32>
      %c0_28 = arith.constant 0 : index
      %c0_29 = arith.constant 0 : index
      %22 = vector.load %arg11[%c0_28, %c0_29] : memref<8x32xf32, #tpu.memory_space<vmem>>, vector<8x32xf32>
      tpu.vector_store %arg11[%c0_28, %c0_29], %21 {strides = array<i32>} : memref<8x32xf32, #tpu.memory_space<vmem>>, vector<8x32xf32>,
      %cst_30 = arith.constant 0.000000e+00 : f32
      %23 = vector.broadcast %cst_30 : f32 to vector<8x32xf32>
      %c0_31 = arith.constant 0 : index
      %c0_32 = arith.constant 0 : index
      %24 = vector.load %arg12[%c0_31, %c0_32] : memref<8x32xf32, #tpu.memory_space<vmem>>, vector<8x32xf32>
      tpu.vector_store %arg12[%c0_31, %c0_32], %23 {strides = array<i32>} : memref<8x32xf32, #tpu.memory_space<vmem>>, vector<8x32xf32>,
    } else {
    }
    %c0 = arith.constant 0 : index
    %c0_1 = arith.constant 0 : index
    %3 = vector.load %arg9[%c0, %c0_1] : memref<8x32xf32, #tpu.memory_space<vmem>>, vector<8x32xf32>
    %c0_2 = arith.constant 0 : index
    %c0_3 = arith.constant 0 : index
    %4 = vector.load %arg10[%c0_2, %c0_3] : memref<8x32xf32, #tpu.memory_space<vmem>>, vector<8x32xf32>
    %c0_4 = arith.constant 0 : index
    %c0_5 = arith.constant 0 : index
    %5 = vector.load %arg11[%c0_4, %c0_5] : memref<8x32xf32, #tpu.memory_space<vmem>>, vector<8x32xf32>
    %c0_6 = arith.constant 0 : index
    %c0_7 = arith.constant 0 : index
    %6 = vector.load %arg12[%c0_6, %c0_7] : memref<8x32xf32, #tpu.memory_space<vmem>>, vector<8x32xf32>
    %c0_i32_8 = arith.constant 0 : i32
    %c3_i32 = arith.constant 3 : i32
    %7 = arith.addi %c0_i32_8, %c3_i32 : i32
    %c1_i32 = arith.constant 1 : i32
    %8:4 = scf.for %arg13 = %c0_i32_8 to %7 step %c1_i32 iter_args(%arg14 = %3, %arg15 = %4, %arg16 = %5, %arg17 = %6) -> (vector<8x32xf32>, vector<8x32xf32>, vector<8x32xf32>, vector<8x32xf32>)  : i32 {
      %17 = arith.truncf %arg14 : vector<8x32xf32> to vector<8x32xbf16>
      %c0_22 = arith.constant 0 : index
      %c0_23 = arith.constant 0 : index
      %18 = vector.load %arg3[%c0_22, %c0_23] : memref<32x128xbf16, #tpu.memory_space<vmem>>, vector<32x128xbf16>
      %cst = arith.constant dense<0.000000e+00> : vector<8x128xf32>
      %19 = tpu.matmul %17, %18, %cst {dimension_numbers = #tpu.dot_dimension_numbers<[1], [0], [0], [1], [0, 0, 1, 1], [], []>} : vector<8x32xbf16>, vector<32x128xbf16>, vector<8x128xf32> -> vector<8x128xf32>
      %20 = arith.truncf %arg16 : vector<8x32xf32> to vector<8x32xbf16>
      %c0_24 = arith.constant 0 : index
      %c0_25 = arith.constant 0 : index
      %21 = vector.load %arg4[%c0_24, %c0_25] : memref<32x128xbf16, #tpu.memory_space<vmem>>, vector<32x128xbf16>
      %cst_26 = arith.constant dense<0.000000e+00> : vector<8x128xf32>
      %22 = tpu.matmul %20, %21, %cst_26 {dimension_numbers = #tpu.dot_dimension_numbers<[1], [0], [0], [1], [0, 0, 1, 1], [], []>} : vector<8x32xbf16>, vector<32x128xbf16>, vector<8x128xf32> -> vector<8x128xf32>
      %23 = arith.index_cast %arg13 : i32 to index
      %c0_27 = arith.constant 0 : index
      %c0_28 = arith.constant 0 : index
      %24 = vector.load %arg1[%23, %c0_27, %c0_28] : memref<3x8x128xbf16, #tpu.memory_space<vmem>>, vector<1x8x128xbf16>
      %25 = vector.shape_cast %24 : vector<1x8x128xbf16> to vector<8x128xbf16>
      %26 = arith.extf %25 : vector<8x128xbf16> to vector<8x128xf32>
      %27 = arith.addf %19, %26 : vector<8x128xf32>
      %c2_i32 = arith.constant 2 : i32
      %28 = arith.subi %c2_i32, %arg13 : i32
      %29 = arith.index_cast %28 : i32 to index
      %c0_29 = arith.constant 0 : index
      %c0_30 = arith.constant 0 : index
      %30 = vector.load %arg2[%29, %c0_29, %c0_30] : memref<3x8x128xbf16, #tpu.memory_space<vmem>>, vector<1x8x128xbf16>
      %31 = vector.shape_cast %30 : vector<1x8x128xbf16> to vector<8x128xbf16>
      %32 = arith.extf %31 : vector<8x128xbf16> to vector<8x128xf32>
      %33 = arith.addf %22, %32 : vector<8x128xf32>
      %34 = vector.extract_strided_slice %27 {offsets = [0, 0], sizes = [8, 32], strides = [1, 1]} : vector<8x128xf32> to vector<8x32xf32>
      %35 = arith.negf %34 : vector<8x32xf32>
      %36 = math.exp %35 : vector<8x32xf32>
      %cst_31 = arith.constant 1.000000e+00 : f32
      %37 = vector.broadcast %cst_31 : f32 to vector<8x32xf32>
      %38 = arith.addf %37, %36 : vector<8x32xf32>
      %39 = arith.divf %37, %38 : vector<8x32xf32>
      %40 = vector.extract_strided_slice %27 {offsets = [0, 32], sizes = [8, 32], strides = [1, 1]} : vector<8x128xf32> to vector<8x32xf32>
      %41 = arith.negf %40 : vector<8x32xf32>
      %42 = math.exp %41 : vector<8x32xf32>
      %cst_32 = arith.constant 1.000000e+00 : f32
      %43 = vector.broadcast %cst_32 : f32 to vector<8x32xf32>
      %44 = arith.addf %43, %42 : vector<8x32xf32>
      %45 = arith.divf %43, %44 : vector<8x32xf32>
      %46 = vector.extract_strided_slice %27 {offsets = [0, 64], sizes = [8, 32], strides = [1, 1]} : vector<8x128xf32> to vector<8x32xf32>
      %47 = math.tanh %46 : vector<8x32xf32>
      %48 = vector.extract_strided_slice %27 {offsets = [0, 96], sizes = [8, 32], strides = [1, 1]} : vector<8x128xf32> to vector<8x32xf32>
      %49 = arith.negf %48 : vector<8x32xf32>
      %50 = math.exp %49 : vector<8x32xf32>
      %cst_33 = arith.constant 1.000000e+00 : f32
      %51 = vector.broadcast %cst_33 : f32 to vector<8x32xf32>
      %52 = arith.addf %51, %50 : vector<8x32xf32>
      %53 = arith.divf %51, %52 : vector<8x32xf32>
      %54 = vector.extract_strided_slice %33 {offsets = [0, 0], sizes = [8, 32], strides = [1, 1]} : vector<8x128xf32> to vector<8x32xf32>
      %55 = arith.negf %54 : vector<8x32xf32>
      %56 = math.exp %55 : vector<8x32xf32>
      %cst_34 = arith.constant 1.000000e+00 : f32
      %57 = vector.broadcast %cst_34 : f32 to vector<8x32xf32>
      %58 = arith.addf %57, %56 : vector<8x32xf32>
      %59 = arith.divf %57, %58 : vector<8x32xf32>
      %60 = vector.extract_strided_slice %33 {offsets = [0, 32], sizes = [8, 32], strides = [1, 1]} : vector<8x128xf32> to vector<8x32xf32>
      %61 = arith.negf %60 : vector<8x32xf32>
      %62 = math.exp %61 : vector<8x32xf32>
      %cst_35 = arith.constant 1.000000e+00 : f32
      %63 = vector.broadcast %cst_35 : f32 to vector<8x32xf32>
      %64 = arith.addf %63, %62 : vector<8x32xf32>
      %65 = arith.divf %63, %64 : vector<8x32xf32>
      %66 = vector.extract_strided_slice %33 {offsets = [0, 64], sizes = [8, 32], strides = [1, 1]} : vector<8x128xf32> to vector<8x32xf32>
      %67 = math.tanh %66 : vector<8x32xf32>
      %68 = vector.extract_strided_slice %33 {offsets = [0, 96], sizes = [8, 32], strides = [1, 1]} : vector<8x128xf32> to vector<8x32xf32>
      %69 = arith.negf %68 : vector<8x32xf32>
      %70 = math.exp %69 : vector<8x32xf32>
      %cst_36 = arith.constant 1.000000e+00 : f32
      %71 = vector.broadcast %cst_36 : f32 to vector<8x32xf32>
      %72 = arith.addf %71, %70 : vector<8x32xf32>
      %73 = arith.divf %71, %72 : vector<8x32xf32>
      %74 = arith.mulf %45, %arg15 : vector<8x32xf32>
      %75 = arith.mulf %39, %47 : vector<8x32xf32>
      %76 = arith.addf %74, %75 : vector<8x32xf32>
      %77 = arith.mulf %65, %arg17 : vector<8x32xf32>
      %78 = arith.mulf %59, %67 : vector<8x32xf32>
      %79 = arith.addf %77, %78 : vector<8x32xf32>
      %80 = math.tanh %76 : vector<8x32xf32>
      %81 = arith.mulf %53, %80 : vector<8x32xf32>
      %82 = math.tanh %79 : vector<8x32xf32>
      %83 = arith.mulf %73, %82 : vector<8x32xf32>
      %c3_i32_37 = arith.constant 3 : i32
      %84 = arith.muli %arg0, %c3_i32_37 : i32
      %85 = arith.addi %84, %arg13 : i32
      %c8_i32 = arith.constant 8 : i32
      %86 = arith.cmpi slt, %85, %c8_i32 : i32
      %c2_i32_38 = arith.constant 2 : i32
      %87 = arith.subi %c2_i32_38, %arg0 : i32
      %c3_i32_39 = arith.constant 3 : i32
      %88 = arith.muli %87, %c3_i32_39 : i32
      %c2_i32_40 = arith.constant 2 : i32
      %89 = arith.subi %c2_i32_40, %arg13 : i32
      %90 = arith.addi %88, %89 : i32
      %c8_i32_41 = arith.constant 8 : i32
      %91 = arith.cmpi slt, %90, %c8_i32_41 : i32
      %92 = arith.select %86, %81, %arg14 : vector<8x32xf32>
      %93 = arith.select %86, %76, %arg15 : vector<8x32xf32>
      %94 = arith.select %91, %83, %arg16 : vector<8x32xf32>
      %95 = arith.select %91, %79, %arg17 : vector<8x32xf32>
      %96 = arith.index_cast %arg13 : i32 to index
      %c0_42 = arith.constant 0 : index
      %c0_43 = arith.constant 0 : index
      %97 = vector.load %arg5[%96, %c0_42, %c0_43] : memref<3x8x32xf32, #tpu.memory_space<vmem>>, vector<1x8x32xf32>
      %98 = vector.shape_cast %97 : vector<1x8x32xf32> to vector<8x32xf32>
      %99 = vector.shape_cast %92 : vector<8x32xf32> to vector<1x8x32xf32>
      tpu.vector_store %arg5[%96, %c0_42, %c0_43], %99 {strides = array<i32>} : memref<3x8x32xf32, #tpu.memory_space<vmem>>, vector<1x8x32xf32>,
      %c2_i32_44 = arith.constant 2 : i32
      %100 = arith.subi %c2_i32_44, %arg13 : i32
      %101 = arith.index_cast %100 : i32 to index
      %c0_45 = arith.constant 0 : index
      %c0_46 = arith.constant 0 : index
      %102 = vector.load %arg6[%101, %c0_45, %c0_46] : memref<3x8x32xf32, #tpu.memory_space<vmem>>, vector<1x8x32xf32>
      %103 = vector.shape_cast %102 : vector<1x8x32xf32> to vector<8x32xf32>
      %104 = vector.shape_cast %94 : vector<8x32xf32> to vector<1x8x32xf32>
      tpu.vector_store %arg6[%101, %c0_45, %c0_46], %104 {strides = array<i32>} : memref<3x8x32xf32, #tpu.memory_space<vmem>>, vector<1x8x32xf32>,
      scf.yield %92, %93, %94, %95 : vector<8x32xf32>, vector<8x32xf32>, vector<8x32xf32>, vector<8x32xf32>
    }
    %c3_i32_9 = arith.constant 3 : i32
    %c0_10 = arith.constant 0 : index
    %c0_11 = arith.constant 0 : index
    %9 = vector.load %arg9[%c0_10, %c0_11] : memref<8x32xf32, #tpu.memory_space<vmem>>, vector<8x32xf32>
    tpu.vector_store %arg9[%c0_10, %c0_11], %8#0 {strides = array<i32>} : memref<8x32xf32, #tpu.memory_space<vmem>>, vector<8x32xf32>,
    %c0_12 = arith.constant 0 : index
    %c0_13 = arith.constant 0 : index
    %10 = vector.load %arg10[%c0_12, %c0_13] : memref<8x32xf32, #tpu.memory_space<vmem>>, vector<8x32xf32>
    tpu.vector_store %arg10[%c0_12, %c0_13], %8#1 {strides = array<i32>} : memref<8x32xf32, #tpu.memory_space<vmem>>, vector<8x32xf32>,
    %c0_14 = arith.constant 0 : index
    %c0_15 = arith.constant 0 : index
    %11 = vector.load %arg11[%c0_14, %c0_15] : memref<8x32xf32, #tpu.memory_space<vmem>>, vector<8x32xf32>
    tpu.vector_store %arg11[%c0_14, %c0_15], %8#2 {strides = array<i32>} : memref<8x32xf32, #tpu.memory_space<vmem>>, vector<8x32xf32>,
    %c0_16 = arith.constant 0 : index
    %c0_17 = arith.constant 0 : index
    %12 = vector.load %arg12[%c0_16, %c0_17] : memref<8x32xf32, #tpu.memory_space<vmem>>, vector<8x32xf32>
    tpu.vector_store %arg12[%c0_16, %c0_17], %8#3 {strides = array<i32>} : memref<8x32xf32, #tpu.memory_space<vmem>>, vector<8x32xf32>,
    %13 = tpu.concatenate %8#0, %8#2 in 1 : vector<8x32xf32>, vector<8x32xf32> -> vector<8x64xf32>
    %c0_18 = arith.constant 0 : index
    %c0_19 = arith.constant 0 : index
    %14 = vector.load %arg7[%c0_18, %c0_19] : memref<8x64xf32, #tpu.memory_space<vmem>>, vector<8x64xf32>
    tpu.vector_store %arg7[%c0_18, %c0_19], %13 {strides = array<i32>} : memref<8x64xf32, #tpu.memory_space<vmem>>, vector<8x64xf32>,
    %15 = tpu.concatenate %8#1, %8#3 in 1 : vector<8x32xf32>, vector<8x32xf32> -> vector<8x64xf32>
    %c0_20 = arith.constant 0 : index
    %c0_21 = arith.constant 0 : index
    %16 = vector.load %arg8[%c0_20, %c0_21] : memref<8x64xf32, #tpu.memory_space<vmem>>, vector<8x64xf32>
    tpu.vector_store %arg8[%c0_20, %c0_21], %15 {strides = array<i32>} : memref<8x64xf32, #tpu.memory_space<vmem>>, vector<8x64xf32>,
    return
  }
  func.func @transform_0(%arg0: i32) -> (i32, i32, i32) {
    %c0_i32 = arith.constant 0 : i32
    %c0_i32_0 = arith.constant 0 : i32
    %c0_i32_1 = arith.constant 0 : i32
    return %arg0, %c0_i32, %c0_i32_0 : i32, i32, i32
  }
  func.func @transform_1(%arg0: i32) -> (i32, i32, i32) {
    %c2_i32 = arith.constant 2 : i32
    %0 = arith.subi %c2_i32, %arg0 : i32
    %c0_i32 = arith.constant 0 : i32
    %c1_i32 = arith.constant 1 : i32
    %c0_i32_0 = arith.constant 0 : i32
    return %0, %c0_i32, %c1_i32 : i32, i32, i32
  }
  func.func @transform_2(%arg0: i32) -> (i32, i32) {
    %c0_i32 = arith.constant 0 : i32
    %c0_i32_0 = arith.constant 0 : i32
    %c0_i32_1 = arith.constant 0 : i32
    return %c0_i32, %c0_i32_0 : i32, i32
  }
  func.func @transform_3(%arg0: i32) -> (i32, i32) {
    %c0_i32 = arith.constant 0 : i32
    %c0_i32_0 = arith.constant 0 : i32
    %c0_i32_1 = arith.constant 0 : i32
    return %c0_i32, %c0_i32_0 : i32, i32
  }
  func.func @transform_4(%arg0: i32) -> (i32, i32, i32) {
    %c0_i32 = arith.constant 0 : i32
    %c0_i32_0 = arith.constant 0 : i32
    %c0_i32_1 = arith.constant 0 : i32
    return %arg0, %c0_i32, %c0_i32_0 : i32, i32, i32
  }
  func.func @transform_5(%arg0: i32) -> (i32, i32, i32) {
    %c2_i32 = arith.constant 2 : i32
    %0 = arith.subi %c2_i32, %arg0 : i32
    %c0_i32 = arith.constant 0 : i32
    %c0_i32_0 = arith.constant 0 : i32
    %c0_i32_1 = arith.constant 0 : i32
    return %0, %c0_i32, %c0_i32_0 : i32, i32, i32
  }
  func.func @transform_6(%arg0: i32) -> (i32, i32) {
    %c0_i32 = arith.constant 0 : i32
    %c0_i32_0 = arith.constant 0 : i32
    %c0_i32_1 = arith.constant 0 : i32
    return %c0_i32, %c0_i32_0 : i32, i32
  }
  func.func @transform_7(%arg0: i32) -> (i32, i32) {
    %c0_i32 = arith.constant 0 : i32
    %c0_i32_0 = arith.constant 0 : i32
    %c0_i32_1 = arith.constant 0 : i32
    return %c0_i32, %c0_i32_0 : i32, i32
  }
}

</mosaic_0001>

<bundles_post_ra>
// kernel: _lambda_.4
= control target key start
LH: loop header
LB: loop body
LE: loop exit
PB: predicated region body
PF: predicated region fallthrough
CT: control target
= control target key end

     0   :  { %vm47_vm0 = vcmask 130048   ;;  %s272_s1 = inlined_call_operand.vmem [shape: bf16[16,256], index: 1, kind: input, shape index: {}]   ;;  %s273_s0 = inlined_call_operand.vmem [shape: f32[9,8,16], index: 0, kind: input, shape index: {}]   ;;  %s274_s2 = inlined_call_operand.vmem [shape: f32[1,256], index: 2, kind: input, shape index: {}]   ;;  %s275_s3 = inlined_call_operand.vmem [shape: bf16[9,8,256], index: 3, kind: output, shape index: {}]  }
   0x1   :  { %v153_v0 = vld [vmem:[%s272_s1] sm:$0xf]  ;;  %v170_v1 = vld [vmem:[%s272_s1 + $0x4] sm:$0xf0]  ;;  %v169_v2 = vld [vmem:[%s272_s1 + $0x4] sm:$0xf] }
   0x2   :  { %v154_v3 = vor.u32 %v170_v1, %v153_v0  ;;  %v155_v4 = vld [vmem:[%s272_s1 + $0x8] sm:$0xf0]  ;;  %v15_v5 = vld [vmem:[%s273_s0] sm:$0xff]  ;;  %v21_v9 = vld [vmem:[%s273_s0 + $0x30] sm:$0xff] }
   0x3   :  { %v16_v6 = vld [vmem:[%s273_s0 + $0x8] sm:$0xff]  ;;  %v158_v7 = vor.u32 %v169_v2, %v155_v4  ;;  %v22_v10 = vld [vmem:[%s273_s0 + $0x38] sm:$0xff]  ;;  %v17_v12 = vld [vmem:[%s273_s0 + $0x10] sm:$0xff] }
   0x4   :  { %v24_v8 = vpack.c.bf16 %v16_v6, %v15_v5  ;;  %70 = vmatpush.bf16.msra.mxu0 %v154_v3  ;;  %171 = vmatpush.bf16.msra.mxu2 %v154_v3  ;;  %v27_v11 = vpack.c.bf16 %v22_v10, %v21_v9  ;;  %v18_v13 = vld [vmem:[%s273_s0 + $0x18] sm:$0xff]  ;;  %v23_v14 = vld [vmem:[%s273_s0 + $0x40] sm:$0xff]  ;;  %v20_v18 = vld [vmem:[%s273_s0 + $0x28] sm:$0xff] }
   0x5   :  { %103 = vmatpush.bf16.msra.mxu1 %v158_v7  ;;  %172 = vmatpush.bf16.msra.mxu3 %v158_v7  ;;  %v25_v15 = vpack.c.bf16 %v18_v13, %v17_v12  ;;  %v28_v16 = vpack.c.bf16 %v23_v14, %v23_v14  ;;  %v19_v17 = vld [vmem:[%s273_s0 + $0x20] sm:$0xff] }
   0x6   :  { %v26_v19 = vpack.c.bf16 %v20_v18, %v19_v17  ;;  %v31_v20 = vld [vmem:[%s274_s2] sm:$0x3] }
   0x7   :  { %159 = vmatmul.msk.bf16.vlgmr.msra.gmra.mxu0 %vm47_vm0, %v24_v8  ;;  %162 = vmatmul.msk.bf16.vlgmr.msra.gmra.mxu2 %vm47_vm0, %v27_v11  ;;  %v33_v21 = vperm.slane %v31_v20, 0  ;;  %v34_v22 = vperm.slane %v31_v20, 1 }
   0x8   :  { %164 = vmatmul.msk.bf16.vlgmr.msra.gmra.mxu1 %vm47_vm0, %v24_v8  ;;  %167 = vmatmul.msk.bf16.vlgmr.msra.gmra.mxu3 %vm47_vm0, %v27_v11 }
  0x17   :  { %160 = vmatmul.msk.bf16.gmra.mxu0 %vm47_vm0, %v25_v15  ;;  %163 = vmatmul.msk.bf16.gmra.mxu2 %vm47_vm0, %v28_v16 }
  0x18   :  { %165 = vmatmul.msk.bf16.gmra.mxu1 %vm47_vm0, %v25_v15  ;;  %168 = vmatmul.msk.bf16.gmra.mxu3 %vm47_vm0, %v28_v16 }
  0x27   :  { %161 = vmatmul.msk.bf16.gmra.mxu0 %vm47_vm0, %v26_v19 }
  0x28   :  { %166 = vmatmul.msk.bf16.gmra.mxu1 %vm47_vm0, %v26_v19 }
  0x84   :  { %v72_v23 = vpop.f32.mrf.mxu0 }
  0x85   :  { %v73_v24 = vadd.f32 %v72_v23, %v33_v21  ;;  %v105_v25 = vpop.f32.mrf.mxu1 }
  0x86   :  { %v106_v26 = vadd.f32 %v105_v25, %v34_v22 }
  0x88   :  { %v129_v27 = vpack.c.bf16 %v106_v26, %v73_v24 }
  0x8a   :  { %138 = vst [vmem:[%s275_s3] sm:$0xff] %v129_v27  ;;  %v87_v28 = vpop.f32.mrf.mxu2 }
  0x8b   :  { %v88_v29 = vadd.f32 %v87_v28, %v33_v21  ;;  %v120_v30 = vpop.f32.mrf.mxu3 }
  0x8c   :  { %v74_v31 = vpop.f32.mrf.mxu0  ;;  %v121_v32 = vadd.f32 %v120_v30, %v34_v22 }
  0x8d   :  { %v75_v33 = vadd.f32 %v74_v31, %v33_v21  ;;  %v107_v34 = vpop.f32.mrf.mxu1 }
  0x8e   :  { %v108_v35 = vadd.f32 %v107_v34, %v34_v22  ;;  %v135_v36 = vpack.c.bf16 %v121_v32, %v88_v29 }
  0x90   :  { %v130_v37 = vpack.c.bf16 %v108_v35, %v75_v33  ;;  %144 = vst [vmem:[%s275_s3 + $0x30] sm:$0xff] %v135_v36 }
  0x92   :  { %139 = vst [vmem:[%s275_s3 + $0x8] sm:$0xff] %v130_v37  ;;  %v89_v38 = vpop.f32.mrf.mxu2 }
  0x93   :  { %v90_v39 = vadd.f32 %v89_v38, %v33_v21  ;;  %v122_v40 = vpop.f32.mrf.mxu3 }
  0x94   :  { %v77_v41 = vpop.f32.mrf.mxu0  ;;  %v123_v42 = vadd.f32 %v122_v40, %v34_v22 }
  0x95   :  { %v78_v43 = vadd.f32 %v77_v41, %v33_v21  ;;  %v110_v44 = vpop.f32.mrf.mxu1 }
  0x96   :  { %v111_v45 = vadd.f32 %v110_v44, %v34_v22  ;;  %v136_v46 = vpack.c.bf16 %v123_v42, %v90_v39 }
  0x98   :  { %v131_v47 = vpack.c.bf16 %v111_v45, %v78_v43  ;;  %145 = vst [vmem:[%s275_s3 + $0x38] sm:$0xff] %v136_v46 }
  0x9a   :  { %140 = vst [vmem:[%s275_s3 + $0x10] sm:$0xff] %v131_v47  ;;  %v92_v48 = vpop.f32.mrf.mxu2 }
  0x9b   :  { %v93_v49 = vadd.f32 %v92_v48, %v33_v21  ;;  %v125_v50 = vpop.f32.mrf.mxu3 }
  0x9c   :  { %v79_v51 = vpop.f32.mrf.mxu0  ;;  %v126_v52 = vadd.f32 %v125_v50, %v34_v22 }
  0x9d   :  { %v80_v53 = vadd.f32 %v79_v51, %v33_v21  ;;  %v112_v54 = vpop.f32.mrf.mxu1 }
  0x9e   :  { %v113_v55 = vadd.f32 %v112_v54, %v34_v22  ;;  %v137_v56 = vpack.c.bf16 %v126_v52, %v93_v49 }
  0xa0   :  { %v132_v57 = vpack.c.bf16 %v113_v55, %v80_v53  ;;  %146 = vst [vmem:[%s275_s3 + $0x40] sm:$0xff] %v137_v56 }
  0xa2   :  { %141 = vst [vmem:[%s275_s3 + $0x18] sm:$0xff] %v132_v57  ;;  %v94_v58 = vpop.f32.mrf.mxu2 }
  0xa3   :  { %v127_v59 = vpop.f32.mrf.mxu3 }
  0xa4   :  { %v82_v60 = vpop.f32.mrf.mxu0 }
  0xa5   :  { %v83_v61 = vadd.f32 %v82_v60, %v33_v21  ;;  %v115_v62 = vpop.f32.mrf.mxu1 }
  0xa6   :  { %v116_v63 = vadd.f32 %v115_v62, %v34_v22 }
  0xa8   :  { %v133_v0 = vpack.c.bf16 %v116_v63, %v83_v61 }
  0xaa   :  { %142 = vst [vmem:[%s275_s3 + $0x20] sm:$0xff] %v133_v0 }
  0xac   :  { %v84_v1 = vpop.f32.mrf.mxu0 }
  0xad   :  { %v85_v2 = vadd.f32 %v84_v1, %v33_v21  ;;  %v117_v3 = vpop.f32.mrf.mxu1 }
  0xae   :  { %v118_v4 = vadd.f32 %v117_v3, %v34_v22 }
  0xb0   :  { %v134_v5 = vpack.c.bf16 %v118_v4, %v85_v2 }
  0xb2   :  { %143 = vst [vmem:[%s275_s3 + $0x28] sm:$0xff] %v134_v5 }

// kernel: _lambda_.5
= control target key start
LH: loop header
LB: loop body
LE: loop exit
PB: predicated region body
PF: predicated region fallthrough
CT: control target
= control target key end

     0   :  { %s1117_s24 = smov 0   ;;  %s1119_s25 = smov 0   ;;  %s1331_s0 = inlined_call_operand.vmem [shape: bf16[9,8,256], index: 0, kind: input, shape index: {}, may-alias: {0,1}]   ;;  %s1332_s1 = inlined_call_operand.vmem [shape: bf16[9,8,256], index: 1, kind: input, shape index: {}, may-alias: {0,1}]   ;;  %s1333_s2 = inlined_call_operand.vmem [shape: bf16[32,128], index: 2, kind: input, shape index: {}]   ;;  %s1334_s3 = inlined_call_operand.vmem [shape: bf16[32,128], index: 3, kind: input, shape index: {}]   ;;  %s1335_s4 = inlined_call_operand.vmem [shape: bf16[9,8,32], index: 4, kind: output, shape index: {0}]   ;;  %s1336_s5 = inlined_call_operand.vmem [shape: bf16[9,8,32], index: 5, kind: output, shape index: {1}]   ;;  %s1337_s6 = inlined_call_operand.vmem [shape: f32[8,64], index: 6, kind: output, shape index: {2}]   ;;  %s1338_s7 = inlined_call_operand.vmem [shape: f32[8,64], index: 7, kind: output, shape index: {3}]  }
   0x1   :  { %s1121_s26 = smov 0   ;;  %s1123_s27 = smov 0  }
   0x2   :  { %s1125_s28 = smov 0  }
   0x3 LB: > { %s1143_s29 = sadd.s32 4294967295, %s1050_s28   ;;  %s1146_s30 = sadd.s32 1, %s1050_s28   ;;  %s1050_s28 = sphi %s1125_s28, %s1349_s28   ;;  %s1046_s27 = sphi %s1123_s27, %s1348_s27   ;;  %s1042_s26 = sphi %s1121_s26, %s1347_s26   ;;  %s1038_s25 = sphi %s1119_s25, %s1346_s25   ;;  %s1034_s24 = sphi %s1117_s24, %s1345_s24  }
   0x4   : > { %s22_s8 = ssub.s32 %s1050_s28, %s1146_s30  ;;  %s25_s9 = sadd.s32 1, %s1046_s27 }
   0x5   : > { %p23_p0 = scmp.eq.s32.totalorder %s22_s8, 0  ;;  %p32_p1 = scmp.ne.s32.totalorder %s1046_s27, %s1042_s26 }
   0x6   : > { %p33_p2 = scmp.eq.s32.totalorder %s1050_s28, 0  ;;  %s48_s10 = ssub.s32 2, %s1050_s28 }
   0x7   : > { %s1156_s11 = scalar_select %p23_p0, %s1046_s27, %s25_s9  }
   0x8   : > { %p34_p3 = por %p33_p2, %p32_p1  ;;  %s49_s12 = ssub.s32 2, %s1146_s30 }
   0x9   : > { %s50_s13 = ssub.s32 %s48_s10, %s49_s12  ;;  %s53_s14 = sadd.s32 1, %s1038_s25 }
   0xa   : > { %p51_p4 = scmp.eq.s32.totalorder %s50_s13, 0  ;;  %p60_p5 = scmp.ne.s32.totalorder %s1038_s25, %s1034_s24 }
   0xb   : > { %p843_p7 = scmp.ge.s32.totalorder %s1050_s28, 3 }
   0xc   : > { %s1163_s15 = scalar_select %p51_p4, %s1038_s25, %s53_s14  }
   0xd   : > { %p1165_p6 = por %p60_p5, %p33_p2  ;;  %230 = sbr.rel (%p843_p7) target bundleno = 34 (0x22), region = 24 }
  0x12   : > { %233 = sbr.rel (!%p34_p3) target bundleno = 26 (0x1a), region = 28  ;;  %s235_s17 = sand.u32 (%p34_p3), 1, %s1046_s27  }
  0x13   : > { %s886_s18 = smul.u32 (%p34_p3), 24, %s1050_s28 }
  0x14   : > { %s887_s19 = smul.u32 (%p34_p3), 12, %s235_s17 }
  0x15   : > { %s241_s22 = scalar_lea.vmem (%p34_p3), %s1331_s0, %s886_s18 }
  0x16   : > { %v258_v0 = vld [vmem:[%s241_s22] sm:$0xf] (%p34_p3)  ;;  %v260_v1 = vld [vmem:[%s241_s22 + $0x8] sm:$0xf] (%p34_p3)  ;;  %s237_s23 = scalar_lea.vmem (%p34_p3), [#allocation6], %s887_s19 }
  0x17   : > { %259 = vst [vmem:[%s237_s23] sm:$0xf] %v258_v0  ;;  %v262_v2 = vld [vmem:[%s241_s22 + $0x10] sm:$0xf] }
  0x18   : > { %261 = vst [vmem:[%s237_s23 + $0x4] sm:$0xf] %v260_v1 }
  0x19   : > { %263 = vst [vmem:[%s237_s23 + $0x8] sm:$0xf] %v262_v2 }
  0x1a PF: > { %293 = sbr.rel (!%p1165_p6) target bundleno = 34 (0x22), region = 69  ;;  %s295_s8 = sand.u32 (%p1165_p6), 1, %s1038_s25  }
  0x1b   : > { %s846_s9 = smul.u32 (%p1165_p6), 24, %s48_s10 }
  0x1c   : > { %s888_s12 = smul.u32 (%p1165_p6), 12, %s295_s8 }
  0x1d   : > { %s746_s17 = scalar_lea.vmem (%p1165_p6), %s1332_s1, %s846_s9 }
  0x1e   : > { %v847_v3 = vld [vmem:[%s746_s17 + $0x4] sm:$0xf] (%p1165_p6)  ;;  %v848_v4 = vld [vmem:[%s746_s17 + $0xc] sm:$0xf] (%p1165_p6)  ;;  %s297_s18 = scalar_lea.vmem (%p1165_p6), [#allocation7], %s888_s12 }
  0x1f   : > { %321 = vst [vmem:[%s297_s18] sm:$0xf] %v847_v3  ;;  %v849_v5 = vld [vmem:[%s746_s17 + $0x14] sm:$0xf] }
  0x20   : > { %323 = vst [vmem:[%s297_s18 + $0x4] sm:$0xf] %v848_v4 }
  0x21   : > { %325 = vst [vmem:[%s297_s18 + $0x8] sm:$0xf] %v849_v5 }
  0x22 PF: > { %p850_p8 = scmp.ge.s32.totalorder %s1050_s28, 1  ;;  %p354_p9 = scmp.lt.s32.totalorder %s1050_s28, 4 }
  0x24   : > { %p355_p10 = pnand %p850_p8, %p354_p9 }
  0x25   : > { %s361_s10 = sand.u32 (!%p355_p10), 1, %s1042_s26   ;;  %s368_s16 = sand.u32 (!%p355_p10), 1, %s1034_s24  }
  0x26   : > { %358 = sbr.rel (%p355_p10) target bundleno = 782 (0x30e), region = 110  ;;  %s418_s20 = ssub.s32 (!%p355_p10), 2, %s1143_s29 }
  0x27   : > { %s1185_s19 = smul.u32 (!%p355_p10), 12, %s361_s10  ;;  %p853_p13 = scmp.ne.s32.totalorder (!%p355_p10), %s1143_s29, 0 }
  0x28   : > { %s1188_s21 = smul.u32 (!%p355_p10), 12, %s368_s16 }
  0x29   : > { %s1191_s22 = smul.u32 (!%p355_p10), 3, %s1143_s29 }
  0x2a   : > { %s1193_s28 = smul.u32 (!%p355_p10), 3, %s418_s20  ;;  %s370_s16 = scalar_lea.vmem (!%p355_p10), [#allocation7], %s1188_s21 }
  0x2b   : > { %p413_p11 = scmp.lt.s32.totalorder %s1191_s22, 8 }
  0x2c   : > { %p420_p12 = scmp.lt.s32.totalorder %s1193_s28, 8 }
  0x2d   : > { %s414_s23 = scalar_select %p413_p11, %s1191_s22, 8 }
  0x2e   : > { %s421_s26 = scalar_select %p420_p12, %s1193_s28, 8 }
  0x2f   : > { %s851_s24 = sshll.u32 %s414_s23, 2  ;;  %430 = sbr.rel (%p853_p13) target bundleno = 57 (0x39), region = 122 }
  0x30   : > { %s1202_s12 = scalar_lea.vmem %s1335_s4, %s851_s24  ;;  %s852_s13 = sshll.u32 %s421_s26, 2 }
  0x31   : > { %s1207_s18 = scalar_lea.vmem %s1336_s5, %s852_s13 }
  0x34   : > { %vm431_vm0 = vcmask 261120   ;;  %v1072_v6 = vmov 0.0  }
  0x35   : > { %432 = vst.msk [vmem:[#allocation2] sm:$0xff] %vm431_vm0, %v1072_v6 }
  0x36   : > { %433 = vst.msk [vmem:[#allocation3] sm:$0xff] %vm431_vm0, %v1072_v6 }
  0x37   : > { %434 = vst.msk [vmem:[#allocation4] sm:$0xff] %vm431_vm0, %v1072_v6 }
  0x38   : > { %435 = vst.msk [vmem:[#allocation5] sm:$0xff] %vm431_vm0, %v1072_v6 }
  0x39 PF: > { %s1220_s29 = smov 0  }
  0x3c   : > { %v436_v7 = vld [vmem:[#allocation2] sm:$0xff]  }
  0x3d   : > { %v437_v8 = vld [vmem:[#allocation3] sm:$0xff]  }
  0x3e   : > { %v438_v9 = vld [vmem:[#allocation4] sm:$0xff]  }
  0x3f   : > { %v439_v10 = vld [vmem:[#allocation5] sm:$0xff]  }
  0x40 LB: >> { %v883_v11 = vld [vmem:[%s1333_s2 + $0x8] sm:$0xff]  ;;  %v882_v13 = vld [vmem:[%s1333_s2] sm:$0xff]  ;;  %s1073_s17 = smov 32   ;;  %v450_v15 = vpack.c.bf16 %v1066_v7, %v1066_v7  ;;  %v455_v16 = vpack.c.bf16 %v1058_v9, %v1058_v9  ;;  %vm476_vm1 = vcmask 261120   ;;  %s854_s20 = sshll.u32 %s1070_s29, 2  ;;  %vm640_vm12 = vcmask 257024   ;;  %s1070_s29 = sphi %s1220_s29, %s445_s29   ;;  %v1066_v7 = vphi %v436_v7, %v1344_v7   ;;  %v1062_v8 = vphi %v437_v8, %v1343_v8   ;;  %v1058_v9 = vphi %v438_v9, %v1342_v9   ;;  %v1054_v10 = vphi %v439_v10, %v1341_v10  }
  0x41   : >> { %v885_v12 = vld [vmem:[%s1334_s3 + $0x8] sm:$0xff]  ;;  %486 = vmatpush.bf16.msra.mxu0 %v883_v11  ;;  %v884_v14 = vld [vmem:[%s1334_s3] sm:$0xff]  ;;  %567 = vrot.lane.b32.xlu1 %v1062_v8, %s1073_s17  ;;  %s493_s23 = ssub.s32 2, %s1070_s29  ;;  %s1340_s10 = scalar_lea.vmem [#allocation6], %s1185_s19 }
  0x42   : >> { %519 = vmatpush.bf16.msra.mxu1 %v885_v12  ;;  %s461_s26 = scalar_lea.vmem %s1340_s10, %s854_s20 [#allocation6]  ;;  %s1261_s24 = sshll.u32 %s493_s23, 2 }
  0x43   : >> { %v462_v17 = vld [vmem:[%s461_s26] sm:$0xf]  ;;  %s495_s8 = scalar_lea.vmem %s370_s16, %s1261_s24 [#allocation7]  ;;  %s1074_s9 = smov 64  }
  0x44   : >> { %v463_v18 = vunpack.c.l.bf16 %v462_v17  ;;  %v496_v19 = vld [vmem:[%s495_s8] sm:$0xf]  ;;  %s1075_s13 = smov 96   ;;  %s609_s14 = sadd.s32 %s1070_s29, %s1191_s22 }
  0x45   : >> { %487 = vmatpush.bf16.msra.mxu0 %v882_v13  ;;  %v497_v23 = vunpack.c.l.bf16 %v496_v19  ;;  %p610_p0 = scmp.lt.s32.totalorder %s609_s14, 8  ;;  %s613_s26 = sadd.s32 %s493_s23, %s1193_s28 }
  0x46   : >> { %520 = vmatpush.bf16.msra.mxu1 %v884_v14  ;;  %p614_p1 = scmp.lt.s32.totalorder %s613_s26, 8  ;;  %s639_s23 = scalar_lea.vmem %s1202_s12, %s854_s20 }
  0x47   : >> { %s615_s8 = scalar_select %p610_p0, 1, 0 }
  0x48   : >> { %863 = vmatmul.msk.bf16.vlgmr.msra.gmra.mxu0 %vm476_vm1, %v450_v15  ;;  %s624_s10 = scalar_select %p614_p1, 1, 0 }
  0x49   : >> { %873 = vmatmul.msk.bf16.vlgmr.msra.gmra.mxu1 %vm476_vm1, %v455_v16  ;;  %582 = vrot.lane.b32.xlu1 %v1054_v10, %s1073_s17  ;;  %v616_v5 = vstv %s615_s8  ;;  %s445_s29 = sadd.s32 1, %s1070_s29  }
  0x4a   : >> { %vm617_vm10 = vcmp.eq.s32.totalorder %v616_v5, 1  ;;  %v625_v12 = vstv %s624_s10  ;;  %s648_s10 = scalar_lea.vmem %s1207_s18, %s1261_s24  ;;  %p442_p2 = scmp.ge.s32.totalorder %s445_s29, 3  }
  0x4b   : >> { %vm626_vm11 = vcmp.eq.s32.totalorder %v625_v12, 1  ;;  %vm676_vm13 = vcmask (%p442_p2), 523264  }
  0xb3   : >> { %v568_v59 = vpop.permute.xlu1 %567 }
  0xbb   : >> { %v583_v63 = vpop.permute.xlu1 %582 }
  0xc5   : >> { %v489_v20 = vpop.f32.mrf.mxu0 }
  0xc6   : >> { %v522_v21 = vpop.f32.mrf.mxu1  ;;  %v490_v22 = vadd.f32 %v489_v20, %v463_v18 }
  0xc7   : >> { %v523_v24 = vadd.f32 %v522_v21, %v497_v23 }
  0xc8   : >> { %976 = vtanh.f32 %v490_v22  ;;  %v874_v29 = vmul.f32 -1.442695, %v490_v22 }
  0xc9   : >> { %978 = vtanh.f32 %v523_v24  ;;  %v875_v30 = vmul.f32 -1.442695, %v523_v24 }
  0xca   : >> { %980 = vpow2.f32 %v874_v29 }
  0xcb   : >> { %982 = vpow2.f32 %v875_v30 }
  0xcd   : >> { %v491_v25 = vpop.f32.mrf.mxu0 }
  0xce   : >> { %v524_v26 = vpop.f32.mrf.mxu1  ;;  %v977_v27 = vpop.eup %976 }
  0xcf   : >> { %572 = vrot.lane.b32.xlu0 %v977_v27, %s1074_s9  ;;  %v979_v28 = vpop.eup %978 }
  0xd0   : >> { %v981_v31 = vpop.eup %980 }
  0xd1   : >> { %v529_v32 = vadd.f32 1.0, %v981_v31  ;;  %v983_v33 = vpop.eup %982 }
  0xd2   : >> { %v549_v34 = vadd.f32 1.0, %v983_v33 }
  0xd3   : >> { %984 = vrcp.f32 %v529_v32  ;;  %v541_v43 = vand.u32 2147483648, %v529_v32  ;;  %vm535_vm3 = vweird.f32 %v529_v32  ;;  %v539_v44 = vand.u32 2147483647, %v529_v32 }
  0xd4   : >> { %986 = vrcp.f32 %v549_v34  ;;  %vm555_vm6 = vweird.f32 %v549_v34  ;;  %v561_v49 = vand.u32 2147483648, %v549_v34  ;;  %v559_v52 = vand.u32 2147483647, %v549_v34 }
  0xd5   : >> { %v542_v47 = vor.u32 1.1754944e-38, %v541_v43  ;;  %vm540_vm5 = vcmp.eq.f32.partialorder %v539_v44, 8.507059e+37 }
  0xd6   : >> { %v562_v54 = vor.u32 1.1754944e-38, %v561_v49  ;;  %vm560_vm9 = vcmp.eq.f32.partialorder %v559_v52, 8.507059e+37 }
  0xd7   : >> { %587 = vrot.lane.b32.xlu0 %v979_v28, %s1074_s9 }
  0xd9   : >> { %v985_v35 = vpop.eup %984 }
  0xda   : >> { %v531_v36 = vmul.f32 %v985_v35, %v529_v32  ;;  %v987_v38 = vpop.eup %986  ;;  %vm536_vm2 = vweird.f32 %v985_v35 }
  0xdb   : >> { %v551_v40 = vmul.f32 %v987_v38, %v549_v34  ;;  %vm537_vm4 = vmor %vm535_vm3, %vm536_vm2  ;;  %vm556_vm7 = vweird.f32 %v987_v38 }
  0xdc   : >> { %v532_v37 = vsub.f32 1.0, %v531_v36  ;;  %vm557_vm8 = vmor %vm555_vm6, %vm556_vm7 }
  0xdd   : >> { %v552_v42 = vsub.f32 1.0, %v551_v40 }
  0xde   : >> { %v533_v39 = vmul.f32 %v985_v35, %v532_v37 }
  0xdf   : >> { %v553_v46 = vmul.f32 %v987_v38, %v552_v42 }
  0xe0   : >> { %v534_v41 = vadd.f32 %v985_v35, %v533_v39 }
  0xe1   : >> { %v554_v51 = vadd.f32 %v987_v38, %v553_v46 }
  0xe2   : >> { %v538_v45 = vsel %vm537_vm4, %v985_v35, %v534_v41 }
  0xe3   : >> { %v543_v48 = vsel %vm540_vm5, %v542_v47, %v538_v45  ;;  %v558_v55 = vsel %vm557_vm8, %v987_v38, %v554_v51 }
  0xe4   : >> { %v563_v56 = vsel %vm560_vm9, %v562_v54, %v558_v55  ;;  %v570_v60 = vmul.f32 %v568_v59, %v543_v48 }
  0xe5   : >> { %v585_v0 = vmul.f32 %v583_v63, %v563_v56 }
 0x141   : >> { %v573_v50 = vpop.permute.xlu0 %572 }
 0x142   : >> { %v575_v53 = vmul.f32 %v573_v50, %v543_v48 }
 0x144   : >> { %577 = vrot.lane.b32.xlu2 %v575_v53, %s1073_s17 }
 0x149   : >> { %v588_v57 = vpop.permute.xlu0 %587 }
 0x14a   : >> { %v590_v58 = vmul.f32 %v588_v57, %v563_v56 }
 0x14c   : >> { %592 = vrot.lane.b32.xlu2 %v590_v58, %s1073_s17 }
 0x154   : >> { %619 = vrot.lane.b32.xlu2 %v1066_v7, %s1075_s13 }
 0x19e   : >> { %v578_v61 = vpop.permute.xlu2 %577 }
 0x19f   : >> { %v580_v62 = vadd.f32 %v578_v61, %v570_v60 }
 0x1a1   : >> { %988 = vtanh.f32 %v580_v62  ;;  %v623_v18 = vsel %vm617_vm10, %v580_v62, %v568_v59 }
 0x1a6   : >> { %v593_v1 = vpop.permute.xlu2 %592 }
 0x1a7   : >> { %v989_v2 = vpop.eup %988  ;;  %v595_v3 = vadd.f32 %v593_v1, %v585_v0 }
 0x1a8   : >> { %598 = vrot.lane.b32.xlu0 %v989_v2, %s1074_s9 }
 0x1a9   : >> { %990 = vtanh.f32 %v595_v3  ;;  %v632_v16 = vsel %vm626_vm11, %v595_v3, %v583_v63 }
 0x1ae   : >> { %v620_v7 = vpop.permute.xlu2 %619 }
 0x1af   : >> { %v991_v4 = vpop.eup %990 }
 0x1b0   : >> { %604 = vrot.lane.b32.xlu1 %v991_v4, %s1074_s9  ;;  %628 = vrot.lane.b32.xlu0 %v1058_v9, %s1075_s13 }
 0x21a   : >> { %v599_v6 = vpop.permute.xlu0 %598 }
 0x21b   : >> { %v601_v8 = vmul.f32 %v599_v6, %v543_v48 }
 0x21d   : >> { %v622_v10 = vsel %vm617_vm10, %v601_v8, %v620_v7 }
 0x21e   : >> { %651 = vrot.lane.b32.xlu0 %v622_v10, %s1073_s17  ;;  %v633_v11 = vpack.c.bf16 %v622_v10, %v622_v10 }
 0x220   : >> { %635 = vrot.lane.b32.xlu1 %v633_v11, %s1073_s17 }
 0x222   : >> { %v605_v9 = vpop.permute.xlu1 %604  ;;  %v629_v13 = vpop.permute.xlu0 %628 }
 0x223   : >> { %v607_v14 = vmul.f32 %v605_v9, %v563_v56 }
 0x225   : >> { %v631_v15 = vsel %vm626_vm11, %v607_v14, %v629_v13 }
 0x226   : >> { %v642_v17 = vpack.c.bf16 %v631_v15, %v631_v15  ;;  %663 = vrot.lane.b32.xlu0 %v632_v16, %s1075_s13 }
 0x228   : >> { %655 = vrot.lane.b32.xlu1 %v623_v18, %s1075_s13  ;;  %644 = vrot.lane.b32.xlu2 %v642_v17, %s1073_s17 }
 0x230   : >> { %659 = vrot.lane.b32.xlu2 %v631_v15, %s1073_s17  ;;  %s1076_s17 = smov (%p442_p2), 32  }
 0x282   : >> { %v645_v19 = vpop.permute.xlu2 %644 }
 0x283   : >> { %649 = vst.msk [vmem:[%s648_s10] sm:$0xf] %vm640_vm12, %v645_v19 }
 0x28a   : >> { %v660_v20 = vpop.permute.xlu2 %659  }
 0x28b   : >> { %v1342_v9 = vmov %v660_v20  ;;  %672 = vrot.lane.b32.xlu0 (%p442_p2), %v660_v20, %s1076_s17  ;;  %669 = vst.msk [vmem:[#allocation4] sm:$0xff] (%p442_p2), %vm476_vm1, %v660_v20 }
 0x290   : >> { %v652_v21 = vpop.permute.xlu0 %651  }
 0x291   : >> { %v1344_v7 = vmov %v652_v21  ;;  %667 = vst.msk [vmem:[#allocation2] sm:$0xff] (%p442_p2), %vm476_vm1, %v652_v21 }
 0x292   : >> { %v636_v22 = vpop.permute.xlu1 %635 }
 0x293   : >> { %641 = vst.msk [vmem:[%s639_s23] sm:$0xf] %vm640_vm12, %v636_v22 }
 0x297   : > { %444 = sbr.rel (!%p442_p2) target bundleno = 64 (0x40), region = 204 }
 0x298   : >> { %v664_v23 = vpop.permute.xlu0 %663  }
 0x299   : >> { %v1341_v10 = vmov %v664_v23  ;;  %670 = vst.msk [vmem:[#allocation5] sm:$0xff] (%p442_p2), %vm476_vm1, %v664_v23  ;;  %679 = vrot.lane.b32.xlu0 (%p442_p2), %v664_v23, %s1076_s17 }
 0x29a   : >> { %v656_v24 = vpop.permute.xlu1 %655  }
 0x29b   : >> { %v1343_v8 = vmov %v656_v24  ;;  %668 = vst.msk [vmem:[#allocation3] sm:$0xff] (%p442_p2), %vm476_vm1, %v656_v24 }
 0x2fd   : > { %v673_v25 = vpop.permute.xlu0 %672 }
 0x2fe   : > { %v675_v26 = vsel %vm476_vm1, %v652_v21, %v673_v25 }
 0x2ff   : > { %677 = vst.msk [vmem:[%s1337_s6] sm:$0xff] %vm676_vm13, %v675_v26 }
 0x30b   : > { %v680_v27 = vpop.permute.xlu0 %679 }
 0x30c   : > { %v682_v28 = vsel %vm476_vm1, %v656_v24, %v680_v27 }
 0x30d   : > { %683 = vst.msk [vmem:[%s1338_s7] sm:$0xff] %vm676_vm13, %v682_v28 }
 0x30e PF: > { %p15_p3 = scmp.ge.s32.totalorder %s1146_s30, 5   ;;  %s1345_s24 = smov %s1038_s25 }
 0x30f   : > { %s1346_s25 = smov %s1163_s15  ;;  %s1347_s26 = smov %s1046_s27 }
 0x310   : > { %s1348_s27 = smov %s1156_s11  ;;  %s1349_s28 = smov %s1146_s30 }
 0x311   :  { %17 = sbr.rel (!%p15_p3) target bundleno = 3 (0x3), region = 215 }

// kernel: _lambda_.6
= control target key start
LH: loop header
LB: loop body
LE: loop exit
PB: predicated region body
PF: predicated region fallthrough
CT: control target
= control target key end

     0   :  { %vm90_vm0 = vcmask 261120   ;;  %s622_s3 = inlined_call_operand.vmem [shape: bf16[32,256], index: 3, kind: input, shape index: {}]   ;;  %s623_s2 = inlined_call_operand.vmem [shape: bf16[32,256], index: 2, kind: input, shape index: {}]   ;;  %s624_s1 = inlined_call_operand.vmem [shape: bf16[9,8,32], index: 1, kind: input, shape index: {}]   ;;  %s625_s0 = inlined_call_operand.vmem [shape: bf16[9,8,32], index: 0, kind: input, shape index: {}]   ;;  %s626_s4 = inlined_call_operand.vmem [shape: f32[1,256], index: 4, kind: input, shape index: {}]   ;;  %s627_s5 = inlined_call_operand.vmem [shape: bf16[9,8,256], index: 5, kind: output, shape index: {}]  }
   0x1   :  { %v368_v0 = vld [vmem:[%s622_s3 + $0x10] sm:$0xf]  ;;  %v441_v1 = vld [vmem:[%s622_s3 + $0x14] sm:$0xf0]  ;;  %v440_v2 = vld [vmem:[%s622_s3 + $0x14] sm:$0xf] }
   0x2   :  { %v369_v3 = vor.u32 %v441_v1, %v368_v0  ;;  %v370_v4 = vld [vmem:[%s622_s3 + $0x18] sm:$0xf0]  ;;  %v410_v5 = vld [vmem:[%s623_s2 + $0x10] sm:$0xf]  ;;  %v433_v6 = vld [vmem:[%s623_s2 + $0x14] sm:$0xf0] }
   0x3   :  { %v373_v7 = vor.u32 %v440_v2, %v370_v4  ;;  %v411_v8 = vor.u32 %v433_v6, %v410_v5  ;;  %v432_v9 = vld [vmem:[%s623_s2 + $0x14] sm:$0xf]  ;;  %v412_v10 = vld [vmem:[%s623_s2 + $0x18] sm:$0xf0]  ;;  %v360_v11 = vld [vmem:[%s622_s3] sm:$0xf] }
   0x4   :  { %112 = vmatpush.bf16.msra.mxu0 %v369_v3  ;;  %v415_v12 = vor.u32 %v432_v9, %v412_v10  ;;  %v439_v13 = vld [vmem:[%s622_s3 + $0x4] sm:$0xf0]  ;;  %v438_v14 = vld [vmem:[%s622_s3 + $0x4] sm:$0xf]  ;;  %v362_v15 = vld [vmem:[%s622_s3 + $0x8] sm:$0xf0] }
   0x5   :  { %145 = vmatpush.bf16.msra.mxu1 %v373_v7  ;;  %236 = vmatpush.bf16.msra.mxu2 %v411_v8  ;;  %v361_v16 = vor.u32 %v439_v13, %v360_v11  ;;  %v365_v17 = vor.u32 %v438_v14, %v362_v15  ;;  %v402_v18 = vld [vmem:[%s623_s2] sm:$0xf]  ;;  %v431_v19 = vld [vmem:[%s623_s2 + $0x4] sm:$0xf0]  ;;  %v430_v20 = vld [vmem:[%s623_s2 + $0x4] sm:$0xf] }
   0x6   :  { %269 = vmatpush.bf16.msra.mxu3 %v415_v12  ;;  %v403_v21 = vor.u32 %v431_v19, %v402_v18  ;;  %v404_v22 = vld [vmem:[%s623_s2 + $0x8] sm:$0xf0]  ;;  %v434_v24 = vld [vmem:[%s624_s1] sm:$0xff]  ;;  %v436_v28 = vld [vmem:[%s624_s1 + $0x10] sm:$0xff] }
   0x7   :  { %v407_v23 = vor.u32 %v430_v20, %v404_v22  ;;  %v426_v25 = vld [vmem:[%s625_s0] sm:$0xff]  ;;  %v435_v26 = vld [vmem:[%s624_s1 + $0x8] sm:$0xff]  ;;  %v428_v29 = vld [vmem:[%s625_s0 + $0x10] sm:$0xff] }
   0x8   :  { %113 = vmatpush.bf16.msra.mxu0 %v361_v16  ;;  %v427_v27 = vld [vmem:[%s625_s0 + $0x8] sm:$0xff]  ;;  %v437_v30 = vld [vmem:[%s624_s1 + $0x18] sm:$0xff]  ;;  %v42_v32 = vld [vmem:[%s624_s1 + $0x20] sm:$0xf] }
   0x9   :  { %146 = vmatpush.bf16.msra.mxu1 %v365_v17  ;;  %237 = vmatpush.bf16.msra.mxu2 %v403_v21  ;;  %v429_v31 = vld [vmem:[%s625_s0 + $0x18] sm:$0xff]  ;;  %v29_v33 = vld [vmem:[%s625_s0 + $0x20] sm:$0xf]  ;;  %v64_v34 = vunpack.c.l.b16 %v42_v32 }
   0xa   :  { %270 = vmatpush.bf16.msra.mxu3 %v407_v23  ;;  %v189_v35 = vunpack.c.l.b16 %v29_v33  ;;  %v296_v40 = vld [vmem:[%s626_s4] sm:$0x3] }
   0xb   :  { %374 = vmatmul.msk.bf16.vlgmr.msra.gmra.mxu0 %vm90_vm0, %v434_v24  ;;  %v69_v36 = vpack.c.b16 %v64_v34, %v64_v34  ;;  %v573_v41 = vperm.slane %v296_v40, 0  ;;  %v575_v43 = vperm.slane %v296_v40, 1 }
   0xc   :  { %379 = vmatmul.msk.bf16.vlgmr.msra.gmra.mxu1 %vm90_vm0, %v434_v24  ;;  %416 = vmatmul.msk.bf16.vlgmr.msra.gmra.mxu2 %vm90_vm0, %v426_v25  ;;  %v194_v37 = vpack.c.b16 %v189_v35, %v189_v35 }
   0xd   :  { %421 = vmatmul.msk.bf16.vlgmr.msra.gmra.mxu3 %vm90_vm0, %v426_v25 }
  0x1b   :  { %375 = vmatmul.msk.bf16.gmra.mxu0 %vm90_vm0, %v435_v26 }
  0x1c   :  { %380 = vmatmul.msk.bf16.gmra.mxu1 %vm90_vm0, %v435_v26  ;;  %417 = vmatmul.msk.bf16.gmra.mxu2 %vm90_vm0, %v427_v27 }
  0x1d   :  { %422 = vmatmul.msk.bf16.gmra.mxu3 %vm90_vm0, %v427_v27 }
  0x2b   :  { %376 = vmatmul.msk.bf16.gmra.mxu0 %vm90_vm0, %v436_v28 }
  0x2c   :  { %381 = vmatmul.msk.bf16.gmra.mxu1 %vm90_vm0, %v436_v28  ;;  %418 = vmatmul.msk.bf16.gmra.mxu2 %vm90_vm0, %v428_v29 }
  0x2d   :  { %423 = vmatmul.msk.bf16.gmra.mxu3 %vm90_vm0, %v428_v29 }
  0x3b   :  { %377 = vmatmul.msk.bf16.gmra.mxu0 %vm90_vm0, %v437_v30 }
  0x3c   :  { %382 = vmatmul.msk.bf16.gmra.mxu1 %vm90_vm0, %v437_v30  ;;  %419 = vmatmul.msk.bf16.gmra.mxu2 %vm90_vm0, %v429_v31 }
  0x3d   :  { %424 = vmatmul.msk.bf16.gmra.mxu3 %vm90_vm0, %v429_v31 }
  0x4b   :  { %378 = vmatmul.msk.bf16.gmra.mxu0 %vm90_vm0, %v69_v36 }
  0x4c   :  { %383 = vmatmul.msk.bf16.gmra.mxu1 %vm90_vm0, %v69_v36  ;;  %420 = vmatmul.msk.bf16.gmra.mxu2 %vm90_vm0, %v194_v37 }
  0x4d   :  { %425 = vmatmul.msk.bf16.gmra.mxu3 %vm90_vm0, %v194_v37 }
  0x88   :  { %v115_v38 = vpop.f32.mrf.mxu0 }
  0x89   :  { %v148_v39 = vpop.f32.mrf.mxu1 }
  0x8f   :  { %v239_v42 = vpop.f32.mrf.mxu2 }
  0x90   :  { %v240_v44 = vadd.f32 %v239_v42, %v115_v38  ;;  %v272_v45 = vpop.f32.mrf.mxu3  ;;  %v117_v46 = vpop.f32.mrf.mxu0 }
  0x91   :  { %v273_v47 = vadd.f32 %v272_v45, %v148_v39  ;;  %v150_v48 = vpop.f32.mrf.mxu1 }
  0x92   :  { %v302_v49 = vadd.f32 %v573_v41, %v240_v44 }
  0x93   :  { %v303_v50 = vadd.f32 %v575_v43, %v273_v47 }
  0x95   :  { %v320_v51 = vpack.c.bf16 %v303_v50, %v302_v49 }
  0x97   :  { %329 = vst [vmem:[%s627_s5] sm:$0xff] %v320_v51  ;;  %v241_v52 = vpop.f32.mrf.mxu2 }
  0x98   :  { %v242_v53 = vadd.f32 %v241_v52, %v117_v46  ;;  %v274_v54 = vpop.f32.mrf.mxu3  ;;  %v120_v55 = vpop.f32.mrf.mxu0 }
  0x99   :  { %v275_v56 = vadd.f32 %v274_v54, %v150_v48  ;;  %v153_v57 = vpop.f32.mrf.mxu1 }
  0x9a   :  { %v304_v58 = vadd.f32 %v573_v41, %v242_v53 }
  0x9b   :  { %v305_v59 = vadd.f32 %v575_v43, %v275_v56 }
  0x9d   :  { %v321_v60 = vpack.c.bf16 %v305_v59, %v304_v58 }
  0x9f   :  { %330 = vst [vmem:[%s627_s5 + $0x8] sm:$0xff] %v321_v60  ;;  %v244_v61 = vpop.f32.mrf.mxu2 }
  0xa0   :  { %v245_v62 = vadd.f32 %v244_v61, %v120_v55  ;;  %v277_v63 = vpop.f32.mrf.mxu3  ;;  %v122_v0 = vpop.f32.mrf.mxu0 }
  0xa1   :  { %v278_v1 = vadd.f32 %v277_v63, %v153_v57  ;;  %v155_v2 = vpop.f32.mrf.mxu1 }
  0xa2   :  { %v306_v3 = vadd.f32 %v573_v41, %v245_v62 }
  0xa3   :  { %v307_v4 = vadd.f32 %v575_v43, %v278_v1 }
  0xa5   :  { %v322_v5 = vpack.c.bf16 %v307_v4, %v306_v3 }
  0xa7   :  { %331 = vst [vmem:[%s627_s5 + $0x10] sm:$0xff] %v322_v5  ;;  %v246_v6 = vpop.f32.mrf.mxu2 }
  0xa8   :  { %v247_v7 = vadd.f32 %v246_v6, %v122_v0  ;;  %v279_v8 = vpop.f32.mrf.mxu3  ;;  %v125_v9 = vpop.f32.mrf.mxu0 }
  0xa9   :  { %v280_v10 = vadd.f32 %v279_v8, %v155_v2  ;;  %v158_v11 = vpop.f32.mrf.mxu1 }
  0xaa   :  { %v308_v12 = vadd.f32 %v573_v41, %v247_v7 }
  0xab   :  { %v309_v13 = vadd.f32 %v575_v43, %v280_v10 }
  0xad   :  { %v323_v14 = vpack.c.bf16 %v309_v13, %v308_v12 }
  0xaf   :  { %332 = vst [vmem:[%s627_s5 + $0x18] sm:$0xff] %v323_v14  ;;  %v249_v15 = vpop.f32.mrf.mxu2 }
  0xb0   :  { %v250_v16 = vadd.f32 %v249_v15, %v125_v9  ;;  %v282_v17 = vpop.f32.mrf.mxu3  ;;  %v127_v18 = vpop.f32.mrf.mxu0 }
  0xb1   :  { %v283_v19 = vadd.f32 %v282_v17, %v158_v11  ;;  %v160_v20 = vpop.f32.mrf.mxu1 }
  0xb2   :  { %v310_v21 = vadd.f32 %v573_v41, %v250_v16 }
  0xb3   :  { %v311_v22 = vadd.f32 %v575_v43, %v283_v19 }
  0xb5   :  { %v324_v23 = vpack.c.bf16 %v311_v22, %v310_v21 }
  0xb7   :  { %333 = vst [vmem:[%s627_s5 + $0x20] sm:$0xff] %v324_v23  ;;  %v251_v24 = vpop.f32.mrf.mxu2 }
  0xb8   :  { %v252_v25 = vadd.f32 %v251_v24, %v127_v18  ;;  %v284_v26 = vpop.f32.mrf.mxu3  ;;  %v130_v27 = vpop.f32.mrf.mxu0 }
  0xb9   :  { %v285_v28 = vadd.f32 %v284_v26, %v160_v20  ;;  %v163_v29 = vpop.f32.mrf.mxu1 }
  0xba   :  { %v312_v30 = vadd.f32 %v573_v41, %v252_v25 }
  0xbb   :  { %v313_v31 = vadd.f32 %v575_v43, %v285_v28 }
  0xbd   :  { %v325_v32 = vpack.c.bf16 %v313_v31, %v312_v30 }
  0xbf   :  { %334 = vst [vmem:[%s627_s5 + $0x28] sm:$0xff] %v325_v32  ;;  %v254_v33 = vpop.f32.mrf.mxu2 }
  0xc0   :  { %v255_v34 = vadd.f32 %v254_v33, %v130_v27  ;;  %v287_v35 = vpop.f32.mrf.mxu3  ;;  %v132_v36 = vpop.f32.mrf.mxu0 }
  0xc1   :  { %v288_v37 = vadd.f32 %v287_v35, %v163_v29  ;;  %v165_v38 = vpop.f32.mrf.mxu1 }
  0xc2   :  { %v314_v39 = vadd.f32 %v573_v41, %v255_v34 }
  0xc3   :  { %v315_v40 = vadd.f32 %v575_v43, %v288_v37 }
  0xc5   :  { %v326_v42 = vpack.c.bf16 %v315_v40, %v314_v39 }
  0xc7   :  { %335 = vst [vmem:[%s627_s5 + $0x30] sm:$0xff] %v326_v42  ;;  %v256_v44 = vpop.f32.mrf.mxu2 }
  0xc8   :  { %v257_v45 = vadd.f32 %v256_v44, %v132_v36  ;;  %v289_v46 = vpop.f32.mrf.mxu3  ;;  %v135_v47 = vpop.f32.mrf.mxu0 }
  0xc9   :  { %v290_v48 = vadd.f32 %v289_v46, %v165_v38  ;;  %v168_v49 = vpop.f32.mrf.mxu1 }
  0xca   :  { %v316_v50 = vadd.f32 %v573_v41, %v257_v45 }
  0xcb   :  { %v317_v51 = vadd.f32 %v575_v43, %v290_v48 }
  0xcd   :  { %v327_v52 = vpack.c.bf16 %v317_v51, %v316_v50 }
  0xcf   :  { %336 = vst [vmem:[%s627_s5 + $0x38] sm:$0xff] %v327_v52  ;;  %v259_v53 = vpop.f32.mrf.mxu2 }
  0xd0   :  { %v260_v54 = vadd.f32 %v259_v53, %v135_v47  ;;  %v292_v55 = vpop.f32.mrf.mxu3  ;;  %v137_v56 = vpop.f32.mrf.mxu0 }
  0xd1   :  { %v293_v57 = vadd.f32 %v292_v55, %v168_v49  ;;  %v170_v58 = vpop.f32.mrf.mxu1 }
  0xd2   :  { %v318_v59 = vadd.f32 %v573_v41, %v260_v54 }
  0xd3   :  { %v319_v60 = vadd.f32 %v575_v43, %v293_v57 }
  0xd5   :  { %v328_v61 = vpack.c.bf16 %v319_v60, %v318_v59 }
  0xd7   :  { %337 = vst [vmem:[%s627_s5 + $0x40] sm:$0xff] %v328_v61  ;;  %v261_v62 = vpop.f32.mrf.mxu2 }
  0xd8   :  { %v294_v63 = vpop.f32.mrf.mxu3 }

// kernel: _lambda_.7
= control target key start
LH: loop header
LB: loop body
LE: loop exit
PB: predicated region body
PF: predicated region fallthrough
CT: control target
= control target key end

     0   :  { %13 = vsyncpa [#allocation9], 0  ;;  %s1556_s0 = inlined_call_operand.vmem [shape: bf16[9,8,256], index: 0, kind: input, shape index: {}, may-alias: {0,1}]   ;;  %s1557_s1 = inlined_call_operand.vmem [shape: bf16[9,8,256], index: 1, kind: input, shape index: {}, may-alias: {0,1}]   ;;  %s1558_s2 = inlined_call_operand.vmem [shape: bf16[32,128], index: 2, kind: input, shape index: {}]   ;;  %s1559_s3 = inlined_call_operand.hbm [shape: bf16[32,128], index: 3, kind: input, shape index: {}]   ;;  %s1560_s4 = inlined_call_operand.vmem [shape: f32[9,8,32], index: 4, kind: output, shape index: {0}]   ;;  %s1561_s5 = inlined_call_operand.vmem [shape: f32[9,8,32], index: 5, kind: output, shape index: {1}]   ;;  %s1562_s6 = inlined_call_operand.hbm [shape: f32[8,64], index: 6, kind: output, shape index: {2}]   ;;  %s1563_s7 = inlined_call_operand.hbm [shape: f32[8,64], index: 7, kind: output, shape index: {3}]  }
   0x1   :  { %14 = vsyncpa [#allocation10], 0 }
   0x2   :  { %15 = vsyncpa [#allocation13], 0  ;;  %s1311_s24 = smov 0   ;;  %s1313_s25 = smov 0  }
   0x3   :  { %s1315_s26 = smov 0   ;;  %s1317_s27 = smov 0  }
   0x4   :  { %s1319_s28 = smov 0  }
   0x5 LB: > { %s1337_s29 = sadd.s32 4294967295, %s1239_s28   ;;  %s1340_s30 = sadd.s32 1, %s1239_s28   ;;  %s1239_s28 = sphi %s1319_s28, %s1577_s28   ;;  %s1235_s27 = sphi %s1317_s27, %s1576_s27   ;;  %s1231_s26 = sphi %s1315_s26, %s1575_s26   ;;  %s1227_s25 = sphi %s1313_s25, %s1574_s25   ;;  %s1223_s24 = sphi %s1311_s24, %s1573_s24  }
   0x6   : > { %s25_s8 = ssub.s32 %s1239_s28, %s1340_s30  ;;  %s28_s9 = sadd.s32 1, %s1235_s27 }
   0x7   : > { %p26_p0 = scmp.eq.s32.totalorder %s25_s8, 0  ;;  %p35_p1 = scmp.ne.s32.totalorder %s1235_s27, %s1231_s26 }
   0x8   : > { %p36_p2 = scmp.eq.s32.totalorder %s1239_s28, 0  ;;  %s1564_s10 = ssub.s32 2, %s1239_s28 }
   0x9   : > { %s1350_s11 = scalar_select %p26_p0, %s1235_s27, %s28_s9  }
   0xa   : > { %p1352_p3 = por %p36_p2, %p35_p1  ;;  %s52_s13 = ssub.s32 2, %s1340_s30 }
   0xb   : > { %s53_s14 = ssub.s32 %s1564_s10, %s52_s13  ;;  %s56_s15 = sadd.s32 1, %s1227_s25 }
   0xc   : > { %p54_p4 = scmp.eq.s32.totalorder %s53_s14, 0  ;;  %p63_p5 = scmp.ne.s32.totalorder %s1227_s25, %s1223_s24 }
   0xd   : > { %p900_p6 = scmp.ge.s32.totalorder %s1239_s28, 1  ;;  %p218_p7 = scmp.lt.s32.totalorder %s1239_s28, 4 }
   0xe   : > { %s1365_s16 = scalar_select %p54_p4, %s1227_s25, %s56_s15  }
   0xf   : > { %p1367_p8 = por %p63_p5, %p36_p2  ;;  %p1371_p9 = pnand %p900_p6, %p218_p7 }
  0x10   : > { %p901_p10 = scmp.ne.s32.totalorder %s1337_s29, 0  ;;  %p971_p11 = scmp.eq.s32.totalorder %s1337_s29, 0 }
  0x11   : > { %p967_p12 = pneg %p1371_p9  ;;  %s232_s21 = sshll.u32 %s1559_s3, 4  ;;  %s233_s21 = int_to_ptr.hbm [resolvable:$true] %s232_s21 }
  0x12   : > { %s1261_s22 = smov [#allocation8]   ;;  %s1262_s8 = smov 64  }
  0x13   : > { %s234_s23 = sshll.u32 %s1261_s22, 4  ;;  %p968_p13 = pnand %p971_p11, %p967_p12  ;;  %s235_s23 = int_to_ptr.vmem [resolvable:$true] %s234_s23 }
  0x14   : > { %s1263_s9 = smov 4   ;;  %p902_p0 = scmp.ge.s32.totalorder %s1239_s28, 3 }
  0x15   : > { %970 = dma.hbm_to_vmem [thread:$0]  (!%p968_p13), %s233_s21, 256, %s235_s23, [#allocation9], %s1262_s8, %s1262_s8, %s1263_s9  }
  0x16   : > { %244 = sbr.rel (%p902_p0) target bundleno = 44 (0x2c), region = 24 }
  0x1b   : > { %247 = sbr.rel (!%p1352_p3) target bundleno = 35 (0x23), region = 28  ;;  %s249_s13 = sand.u32 (%p1352_p3), 1, %s1235_s27  }
  0x1c   : > { %s950_s14 = smul.u32 (%p1352_p3), 24, %s1239_s28 }
  0x1d   : > { %s951_s15 = smul.u32 (%p1352_p3), 12, %s249_s13 }
  0x1e   : > { %s255_s22 = scalar_lea.vmem (%p1352_p3), %s1556_s0, %s950_s14 }
  0x1f   : > { %v272_v0 = vld [vmem:[%s255_s22] sm:$0xf] (%p1352_p3)  ;;  %v274_v1 = vld [vmem:[%s255_s22 + $0x8] sm:$0xf] (%p1352_p3)  ;;  %s251_s10 = scalar_lea.vmem (%p1352_p3), [#allocation6], %s951_s15 }
  0x20   : > { %273 = vst [vmem:[%s251_s10] sm:$0xf] %v272_v0  ;;  %v276_v2 = vld [vmem:[%s255_s22 + $0x10] sm:$0xf] }
  0x21   : > { %275 = vst [vmem:[%s251_s10 + $0x4] sm:$0xf] %v274_v1 }
  0x22   : > { %277 = vst [vmem:[%s251_s10 + $0x8] sm:$0xf] %v276_v2 }
  0x23 PF: > { %307 = sbr.rel (!%p1367_p8) target bundleno = 44 (0x2c), region = 69  ;;  %s309_s12 = sand.u32 (%p1367_p8), 1, %s1227_s25  }
  0x24   : > { %s1568_s21 = ssub.s32 (%p1367_p8), 2, %s1239_s28  ;;  %s952_s8 = smul.u32 (%p1367_p8), 12, %s309_s12 }
  0x25   : > { %s905_s23 = smul.u32 (%p1367_p8), 24, %s1568_s21 }
  0x26   : > { %s311_s15 = scalar_lea.vmem (%p1367_p8), [#allocation7], %s952_s8 }
  0x27   : > { %s783_s14 = scalar_lea.vmem (%p1367_p8), %s1557_s1, %s905_s23 }
  0x28   : > { %v906_v3 = vld [vmem:[%s783_s14 + $0x4] sm:$0xf]  ;;  %v907_v4 = vld [vmem:[%s783_s14 + $0xc] sm:$0xf]  ;;  %v908_v5 = vld [vmem:[%s783_s14 + $0x14] sm:$0xf] }
  0x29   : > { %335 = vst [vmem:[%s311_s15] sm:$0xf] %v906_v3 }
  0x2a   : > { %337 = vst [vmem:[%s311_s15 + $0x4] sm:$0xf] %v907_v4 }
  0x2b   : > { %339 = vst [vmem:[%s311_s15 + $0x8] sm:$0xf] %v908_v5 }
  0x2c PF: > { %372 = sbr.rel (%p1371_p9) target bundleno = 796 (0x31c), region = 110  ;;  %s375_s28 = sand.u32 (!%p1371_p9), 1, %s1231_s26  }
  0x2d   : > { %s382_s10 = sand.u32 (!%p1371_p9), 1, %s1223_s24   ;;  %s1404_s17 = smul.u32 (!%p1371_p9), 12, %s375_s28 }
  0x2e   : > { %s1406_s19 = smul.u32 (!%p1371_p9), 12, %s382_s10 }
  0x2f   : > { %s377_s20 = scalar_lea.vmem (!%p1371_p9), [#allocation6], %s1404_s17 }
  0x30   : > { %s384_s22 = scalar_lea.vmem (!%p1371_p9), [#allocation7], %s1406_s19 }
  0x31   : > { %1210 = dma.done.wait (%p971_p11), [#allocation9], 256  }
  0x32   : > { %1212 = vsyncadd (%p971_p11), [#allocation9], 4294967040  ;;  %s1415_s18 = smul.u32 3, %s1337_s29  ;;  %s437_s24 = ssub.s32 2, %s1337_s29 }
  0x33   : > { %s1418_s26 = smul.u32 3, %s437_s24 }
  0x34   : > { %p432_p1 = scmp.lt.s32.totalorder %s1415_s18, 8 }
  0x35   : > { %p439_p2 = scmp.lt.s32.totalorder %s1418_s26, 8 }
  0x36   : > { %s433_s12 = scalar_select %p432_p1, %s1415_s18, 8 }
  0x37   : > { %s440_s21 = scalar_select %p439_p2, %s1418_s26, 8 }
  0x38   : > { %s911_s23 = sshll.u32 %s433_s12, 3  ;;  %449 = sbr.rel (%p901_p10) target bundleno = 66 (0x42), region = 126 }
  0x39   : > { %s1427_s13 = scalar_lea.vmem %s1560_s4, %s911_s23  ;;  %s912_s14 = sshll.u32 %s440_s21, 3 }
  0x3a   : > { %s1432_s10 = scalar_lea.vmem %s1561_s5, %s912_s14 }
  0x3d   : > { %vm450_vm0 = vcmask 261120   ;;  %v1264_v6 = vmov 0.0  }
  0x3e   : > { %451 = vst.msk [vmem:[#allocation2] sm:$0xff] %vm450_vm0, %v1264_v6 }
  0x3f   : > { %452 = vst.msk [vmem:[#allocation3] sm:$0xff] %vm450_vm0, %v1264_v6 }
  0x40   : > { %453 = vst.msk [vmem:[#allocation4] sm:$0xff] %vm450_vm0, %v1264_v6 }
  0x41   : > { %454 = vst.msk [vmem:[#allocation5] sm:$0xff] %vm450_vm0, %v1264_v6 }
  0x42 PF: > { %s1444_s24 = smov 0  }
  0x45   : > { %v455_v7 = vld [vmem:[#allocation2] sm:$0xff]  }
  0x46   : > { %v456_v8 = vld [vmem:[#allocation3] sm:$0xff]  }
  0x47   : > { %v457_v9 = vld [vmem:[#allocation4] sm:$0xff]  }
  0x48   : > { %v458_v10 = vld [vmem:[#allocation5] sm:$0xff]  }
  0x49 LB: >> { %v947_v11 = vld [vmem:[%s1558_s2 + $0x8] sm:$0xff]  ;;  %v949_v12 = vld [vmem:[#allocation8 + $0x8] sm:$0xff]  ;;  %v946_v13 = vld [vmem:[%s1558_s2] sm:$0xff]  ;;  %s1265_s9 = smov 32   ;;  %v469_v15 = vpack.c.bf16 %v1255_v7, %v1255_v7  ;;  %v474_v16 = vpack.c.bf16 %v1247_v9, %v1247_v9  ;;  %vm495_vm1 = vcmask 261120   ;;  %s914_s14 = sshll.u32 %s1259_s24, 2  ;;  %s1259_s24 = sphi %s1444_s24, %s464_s24   ;;  %v1255_v7 = vphi %v455_v7, %v1572_v7   ;;  %v1251_v8 = vphi %v456_v8, %v1571_v8   ;;  %v1247_v9 = vphi %v457_v9, %v1570_v9   ;;  %v1243_v10 = vphi %v458_v10, %v1569_v10  }
  0x4a   : >> { %505 = vmatpush.bf16.msra.mxu0 %v947_v11  ;;  %538 = vmatpush.bf16.msra.mxu1 %v949_v12  ;;  %v948_v14 = vld [vmem:[#allocation8] sm:$0xff]  ;;  %s1473_s15 = ssub.s32 2, %s1259_s24  ;;  %s480_s28 = scalar_lea.vmem %s377_s20, %s914_s14 [#allocation6] }
  0x4b   : >> { %586 = vrot.lane.b32.xlu1 %v1251_v8, %s1265_s9  ;;  %s924_s12 = sshll.u32 %s1473_s15, 2  ;;  %v481_v17 = vld [vmem:[%s480_s28] sm:$0xf]  ;;  %s1266_s23 = smov 64  }
  0x4c   : >> { %s514_s21 = scalar_lea.vmem %s384_s22, %s924_s12 [#allocation7]  ;;  %v482_v18 = vunpack.c.l.bf16 %v481_v17  ;;  %s1267_s8 = smov 96  }
  0x4d   : >> { %v515_v19 = vld [vmem:[%s514_s21] sm:$0xf]  ;;  %s628_s14 = sadd.s32 %s1259_s24, %s1415_s18  ;;  %s632_s12 = sadd.s32 %s1473_s15, %s1418_s26 }
  0x4e   : >> { %506 = vmatpush.bf16.msra.mxu0 %v946_v13  ;;  %539 = vmatpush.bf16.msra.mxu1 %v948_v14  ;;  %v516_v23 = vunpack.c.l.bf16 %v515_v19  ;;  %p629_p3 = scmp.lt.s32.totalorder %s628_s14, 8  ;;  %p633_p4 = scmp.lt.s32.totalorder %s632_s12, 8 }
  0x50   : >> { %s634_s28 = scalar_select %p629_p3, 1, 0 }
  0x51   : >> { %923 = vmatmul.msk.bf16.vlgmr.msra.gmra.mxu0 %vm495_vm1, %v469_v15  ;;  %933 = vmatmul.msk.bf16.vlgmr.msra.gmra.mxu1 %vm495_vm1, %v474_v16  ;;  %s643_s21 = scalar_select %p633_p4, 1, 0 }
  0x52   : >> { %v635_v5 = vstv %s634_s28  ;;  %s936_s28 = sshll.u32 %s1259_s24, 3  ;;  %s464_s24 = sadd.s32 1, %s1259_s24  }
  0x53   : >> { %601 = vrot.lane.b32.xlu1 %v1243_v10, %s1265_s9  ;;  %vm636_vm10 = vcmp.eq.s32.totalorder %v635_v5, 1  ;;  %s657_s12 = scalar_lea.vmem %s1427_s13, %s936_s28  ;;  %p461_p5 = scmp.ge.s32.totalorder %s464_s24, 3  }
  0x54   : > { %s720_s24 = sshll.u32 (%p461_p5), %s1562_s6, 4  ;;  %vm684_vm12 = vcmask (%p461_p5), 523264   ;;  %p973_p6 = scmp.eq.s32.totalorder (%p461_p5), %s1337_s29, 2  ;;  %s721_s24 = int_to_ptr.hbm [resolvable:$true] %s720_s24 }
  0x55   : > { %s1270_s17 = smov (%p461_p5), [#allocation12]   ;;  %s732_s18 = sshll.u32 (%p461_p5), %s1563_s7, 4  ;;  %s733_s18 = int_to_ptr.hbm [resolvable:$true] %s732_s18 }
  0x56   : > { %s730_s19 = sshll.u32 (%p461_p5), %s1270_s17, 4  ;;  %s731_s19 = int_to_ptr.vmem [resolvable:$true] %s730_s19 }
  0xbd   : >> { %v587_v59 = vpop.permute.xlu1 %586 }
  0xc5   : >> { %v602_v63 = vpop.permute.xlu1 %601 }
  0xce   : >> { %v508_v20 = vpop.f32.mrf.mxu0  ;;  %v541_v21 = vpop.f32.mrf.mxu1 }
  0xcf   : >> { %v509_v22 = vadd.f32 %v508_v20, %v482_v18  ;;  %v542_v24 = vadd.f32 %v541_v21, %v516_v23 }
  0xd1   : >> { %1067 = vtanh.f32 %v509_v22  ;;  %v934_v29 = vmul.f32 -1.442695, %v509_v22  ;;  %v935_v30 = vmul.f32 -1.442695, %v542_v24 }
  0xd2   : >> { %1069 = vtanh.f32 %v542_v24 }
  0xd3   : >> { %1071 = vpow2.f32 %v934_v29 }
  0xd4   : >> { %1073 = vpow2.f32 %v935_v30 }
  0xd6   : >> { %v510_v25 = vpop.f32.mrf.mxu0  ;;  %v543_v26 = vpop.f32.mrf.mxu1 }
  0xd7   : >> { %v1068_v27 = vpop.eup %1067 }
  0xd8   : >> { %591 = vrot.lane.b32.xlu0 %v1068_v27, %s1266_s23  ;;  %v1070_v28 = vpop.eup %1069 }
  0xd9   : >> { %v1072_v31 = vpop.eup %1071 }
  0xda   : >> { %v548_v32 = vadd.f32 1.0, %v1072_v31  ;;  %v1074_v33 = vpop.eup %1073 }
  0xdb   : >> { %v568_v34 = vadd.f32 1.0, %v1074_v33 }
  0xdc   : >> { %1075 = vrcp.f32 %v548_v32  ;;  %v560_v43 = vand.u32 2147483648, %v548_v32  ;;  %vm554_vm3 = vweird.f32 %v548_v32  ;;  %v558_v44 = vand.u32 2147483647, %v548_v32 }
  0xdd   : >> { %1077 = vrcp.f32 %v568_v34  ;;  %vm574_vm6 = vweird.f32 %v568_v34  ;;  %v580_v49 = vand.u32 2147483648, %v568_v34  ;;  %v578_v52 = vand.u32 2147483647, %v568_v34 }
  0xde   : >> { %v561_v47 = vor.u32 1.1754944e-38, %v560_v43  ;;  %vm559_vm5 = vcmp.eq.f32.partialorder %v558_v44, 8.507059e+37 }
  0xdf   : >> { %v581_v54 = vor.u32 1.1754944e-38, %v580_v49  ;;  %vm579_vm9 = vcmp.eq.f32.partialorder %v578_v52, 8.507059e+37 }
  0xe0   : >> { %606 = vrot.lane.b32.xlu0 %v1070_v28, %s1266_s23 }
  0xe2   : >> { %v1076_v35 = vpop.eup %1075 }
  0xe3   : >> { %v550_v36 = vmul.f32 %v1076_v35, %v548_v32  ;;  %v1078_v38 = vpop.eup %1077  ;;  %vm555_vm2 = vweird.f32 %v1076_v35 }
  0xe4   : >> { %v570_v40 = vmul.f32 %v1078_v38, %v568_v34  ;;  %vm556_vm4 = vmor %vm554_vm3, %vm555_vm2  ;;  %vm575_vm7 = vweird.f32 %v1078_v38 }
  0xe5   : >> { %v551_v37 = vsub.f32 1.0, %v550_v36  ;;  %vm576_vm8 = vmor %vm574_vm6, %vm575_vm7 }
  0xe6   : >> { %v571_v42 = vsub.f32 1.0, %v570_v40 }
  0xe7   : >> { %v552_v39 = vmul.f32 %v1076_v35, %v551_v37 }
  0xe8   : >> { %v572_v46 = vmul.f32 %v1078_v38, %v571_v42 }
  0xe9   : >> { %v553_v41 = vadd.f32 %v1076_v35, %v552_v39 }
  0xea   : >> { %v573_v51 = vadd.f32 %v1078_v38, %v572_v46 }
  0xeb   : >> { %v557_v45 = vsel %vm556_vm4, %v1076_v35, %v553_v41 }
  0xec   : >> { %v562_v48 = vsel %vm559_vm5, %v561_v47, %v557_v45  ;;  %v577_v55 = vsel %vm576_vm8, %v1078_v38, %v573_v51 }
  0xed   : >> { %v582_v56 = vsel %vm579_vm9, %v581_v54, %v577_v55  ;;  %v589_v60 = vmul.f32 %v587_v59, %v562_v48 }
  0xee   : >> { %v604_v0 = vmul.f32 %v602_v63, %v582_v56 }
 0x14a   : >> { %v592_v50 = vpop.permute.xlu0 %591 }
 0x14b   : >> { %v594_v53 = vmul.f32 %v592_v50, %v562_v48 }
 0x14d   : >> { %596 = vrot.lane.b32.xlu2 %v594_v53, %s1265_s9 }
 0x152   : >> { %v607_v57 = vpop.permute.xlu0 %606 }
 0x153   : >> { %v609_v58 = vmul.f32 %v607_v57, %v582_v56 }
 0x155   : >> { %611 = vrot.lane.b32.xlu2 %v609_v58, %s1265_s9 }
 0x15d   : >> { %638 = vrot.lane.b32.xlu2 %v1255_v7, %s1267_s8 }
 0x1a7   : >> { %v597_v61 = vpop.permute.xlu2 %596 }
 0x1a8   : >> { %v599_v62 = vadd.f32 %v597_v61, %v589_v60 }
 0x1aa   : >> { %1079 = vtanh.f32 %v599_v62  ;;  %v642_v6 = vsel %vm636_vm10, %v599_v62, %v587_v59 }
 0x1af   : >> { %v612_v1 = vpop.permute.xlu2 %611 }
 0x1b0   : >> { %v1080_v2 = vpop.eup %1079  ;;  %v614_v3 = vadd.f32 %v612_v1, %v604_v0 }
 0x1b1   : >> { %617 = vrot.lane.b32.xlu0 %v1080_v2, %s1266_s23 }
 0x1b2   : >> { %1081 = vtanh.f32 %v614_v3 }
 0x1b7   : >> { %v639_v8 = vpop.permute.xlu2 %638 }
 0x1b8   : >> { %v1082_v4 = vpop.eup %1081 }
 0x1b9   : >> { %647 = vrot.lane.b32.xlu0 %v1247_v9, %s1267_s8  ;;  %623 = vrot.lane.b32.xlu1 %v1082_v4, %s1266_s23  ;;  %v644_v9 = vstv %s643_s21  ;;  %s937_s23 = sshll.u32 %s1473_s15, 3  ;;  %s1269_s15 = smov (%p461_p5), [#allocation11]  }
 0x1ba   : >> { %vm645_vm11 = vcmp.eq.s32.totalorder %v644_v9, 1  ;;  %s664_s14 = scalar_lea.vmem %s1432_s10, %s937_s23 }
 0x1bb   : >> { %v651_v15 = vsel %vm645_vm11, %v614_v3, %v602_v63 }
 0x1c1   : >> { %667 = vrot.lane.b32.xlu0 %v642_v6, %s1267_s8 }
 0x223   : >> { %v618_v7 = vpop.permute.xlu0 %617 }
 0x224   : >> { %v620_v10 = vmul.f32 %v618_v7, %v562_v48 }
 0x226   : >> { %v641_v11 = vsel %vm636_vm10, %v620_v10, %v639_v8 }
 0x227   : >> { %653 = vrot.lane.b32.xlu1 %v641_v11, %s1265_s9 }
 0x22b   : >> { %v648_v12 = vpop.permute.xlu0 %647  ;;  %v624_v13 = vpop.permute.xlu1 %623 }
 0x22c   : >> { %v626_v14 = vmul.f32 %v624_v13, %v582_v56 }
 0x22e   : >> { %v650_v16 = vsel %vm645_vm11, %v626_v14, %v648_v12 }
 0x22f   : >> { %671 = vrot.lane.b32.xlu1 %v651_v15, %s1267_s8  ;;  %660 = vrot.lane.b32.xlu2 %v650_v16, %s1265_s9  ;;  %s1268_s9 = smov (%p461_p5), 32   ;;  %s718_s8 = sshll.u32 (%p461_p5), %s1269_s15, 4  ;;  %s719_s8 = int_to_ptr.vmem [resolvable:$true] %s718_s8 }
 0x233   : >> { %v668_v17 = vpop.permute.xlu0 %667  }
 0x234   : >> { %v1571_v8 = vmov %v668_v17  ;;  %676 = vst.msk [vmem:[#allocation3] sm:$0xff] (%p461_p5), %vm495_vm1, %v668_v17 }
 0x289   : >> { %v661_v18 = vpop.permute.xlu2 %660  }
 0x28a   : >> { %665 = vst.msk [vmem:[%s664_s14] sm:$0xff] %vm495_vm1, %v661_v18  ;;  %v1570_v9 = vmov %v661_v18  ;;  %680 = vrot.lane.b32.xlu0 (%p461_p5), %v661_v18, %s1268_s9 }
 0x28b   : > { %677 = vst.msk [vmem:[#allocation4] sm:$0xff] (%p461_p5), %vm495_vm1, %v661_v18 }
 0x299   : >> { %v654_v19 = vpop.permute.xlu1 %653  }
 0x29a   : >> { %658 = vst.msk [vmem:[%s657_s12] sm:$0xff] %vm495_vm1, %v654_v19  ;;  %v1572_v7 = vmov %v654_v19 }
 0x29b   : > { %675 = vst.msk [vmem:[#allocation2] sm:$0xff] (%p461_p5), %vm495_vm1, %v654_v19 }
 0x29e   : > { %463 = sbr.rel (!%p461_p5) target bundleno = 73 (0x49), region = 210 }
 0x2a1   : >> { %v672_v20 = vpop.permute.xlu1 %671  }
 0x2a2   : >> { %v1569_v10 = vmov %v672_v20  ;;  %678 = vst.msk [vmem:[#allocation5] sm:$0xff] (%p461_p5), %vm495_vm1, %v672_v20  ;;  %687 = vrot.lane.b32.xlu0 (%p461_p5), %v672_v20, %s1268_s9 }
 0x2fc   : > { %v681_v21 = vpop.permute.xlu0 %680 }
 0x2fd   : > { %v683_v22 = vsel %vm495_vm1, %v654_v19, %v681_v21 }
 0x2fe   : > { %685 = vst.msk [vmem:[#allocation11] sm:$0xff] %vm684_vm12, %v683_v22 }
 0x2ff   : > { %960 = dma.vmem_to_hbm [thread:$0]  (%p973_p6), %s719_s8, 128, %s721_s24, [#allocation10]  }
 0x314   : > { %v688_v23 = vpop.permute.xlu0 %687 }
 0x315   : > { %v690_v24 = vsel %vm495_vm1, %v668_v17, %v688_v23 }
 0x316   : > { %691 = vst.msk [vmem:[#allocation12] sm:$0xff] %vm684_vm12, %v690_v24 }
 0x317   : > { %962 = dma.vmem_to_hbm [thread:$0]  (%p973_p6), %s731_s19, 128, %s733_s18, [#allocation13]  }
 0x318   : > { %1214 = dma.done.wait (%p973_p6), [#allocation10], 128  }
 0x319   : > { %1216 = vsyncadd (%p973_p6), [#allocation10], 4294967168 }
 0x31a   : > { %1218 = dma.done.wait (%p973_p6), [#allocation13], 128  }
 0x31b   : > { %1220 = vsyncadd (%p973_p6), [#allocation13], 4294967168 }
 0x31c PF: > { %p18_p7 = scmp.ge.s32.totalorder %s1340_s30, 5   ;;  %s1573_s24 = smov %s1227_s25 }
 0x31d   : > { %s1574_s25 = smov %s1365_s16  ;;  %s1575_s26 = smov %s1235_s27 }
 0x31e   : > { %s1576_s27 = smov %s1350_s11  ;;  %s1577_s28 = smov %s1340_s30 }
 0x31f   :  { %20 = sbr.rel (!%p18_p7) target bundleno = 5 (0x5), region = 221 }
 0x324   :  { %768 = vsyncpa [#allocation9], 1 }
 0x325   :  { %770 = vsyncpa [#allocation9 + $0x1], 1 }
 0x326   :  { %771 = vsyncpa [#allocation10], 1 }
 0x327   :  { %773 = vsyncpa [#allocation10 + $0x1], 1 }
 0x328   :  { %774 = vsyncpa [#allocation13], 1 }

</bundles_post_ra>
